<compile_context>
chip_gen: v5e
topology: v5e:2x2
jax: 0.10.0
libtpu: 0.0.40
codegen_flags: <defaults>
</compile_context>

<pallas_src>
import numpy as np
import jax
import jax.numpy as jnp
from jax.experimental import pallas as pl
from jax.experimental.pallas import tpu as pltpu

# ----------------------------- configuration --------------------------------
B = 2                   # batch
G = 8                   # grid_size_in
P = 2 * G + 1           # 17  patch spatial size
PP = P + 2              # 19  zero-padded patch size (pad=1 for the 3x3 conv)
CIN = 4                 # 3 image channels + 1 one-hot position channel
CCNN = 4                # channels_cnn
MLP = 32                # mlp_dim
NOISE = 8               # noise_attention_dim
DEC_H = 128             # decoder_h_dim (h input is unused: need_decoder=False)
IMG_SCALING = 0.25
EPS = 1e-5              # BatchNorm2d eps
NEG_SLOPE = 0.01        # nn.LeakyReLU default
HO = (P - 1) // 2       # 8  pooled spatial size (floor-mode 2x2/2 max-pool)
NPOS = HO * HO          # 64 attention positions per batch element
NFULL = B * P * P       # 578 valid conv positions (BatchNorm batch statistics)
BSTRIDE = PP * PP       # 361 slab lanes per batch element: lane = b*361 + i*19 + j
NDATA = B * BSTRIDE     # 722 data lanes
POOL_L = 768            # 6*128 lanes carrying pooled / score / softmax values
CONV_L = 896            # 7*128 lanes carrying conv / BN values (>= POOL_L + 20)
SLAB_L = 1024           # 8*128 slab lanes (>= CONV_L + 40 = max tap offset)
W_ROWS, W_COLS = 48, 128

# packed-weight layout, one dense (48,128) f32 buffer:
#   rows 4*t..4*t+3, cols 0..3  : conv tap t = dy*3+dx, (Cout, Cin)
#                                 (conv bias dropped: BN mean-subtraction cancels it)
#   rows 0..31,      cols 4..7  : w1^T (MLP, CCNN)
#   rows 0..31,      col  8     : b1
#   row  40,         cols 0..31 : w2^T
#   row  40,         col  32    : b2
R_W2 = 40


def _build_mask_rows():
    """Constant rows appended under the 4 data channels of the slab:
       row 0   : 1.0 at the 578 valid conv-output lanes (BN statistics mask)
       row 1+b : 1.0 at batch b's 64 pool-output lanes (softmax segment masks)
       row 3   : zeros."""
    m = np.zeros((4, SLAB_L), np.float32)
    for b in range(B):
        base = b * BSTRIDE
        for i in range(P):
            for j in range(P):
                m[0, base + i * PP + j] = 1.0
        for oi in range(HO):
            for oj in range(HO):
                m[1 + b, base + (2 * oi) * PP + 2 * oj] = 1.0
    return m


_MASK_ROWS = _build_mask_rows()


# ------------------------------ Pallas kernel --------------------------------
def _attention_kernel(slab_ref, w_ref, att_ref, z_ref):
    # ---- Conv3x3 via 9 tap-shifted (4,4)@(4,896) MXU matmuls ---------------
    # slab rows 0..3 hold the zero-padded patch, channels on sublanes, lanes =
    # b*361 + i*19 + j; tap (dy,dx) is the same slab shifted by dy*19+dx lanes.
    conv = None
    for t in range(9):
        dy, dx = divmod(t, 3)
        off = dy * PP + dx
        x_t = slab_ref[0:CIN, off:off + CONV_L]                    # (4, 896)
        w_t = w_ref[4 * t:4 * t + CCNN, 0:CIN]                     # (4, 4)
        part = jnp.dot(w_t, x_t, preferred_element_type=jnp.float32)
        conv = part if conv is None else conv + part               # (4, 896)

    # ---- BatchNorm2d (training-mode batch stats, gamma=1, beta=0) + ReLU ----
    # Two-pass statistics over the 578 valid conv lanes (mask on slab row 4).
    cmask = slab_ref[4:5, 0:CONV_L]                                # (1, 896)
    inv_n = 1.0 / float(NFULL)
    mean = jnp.sum(conv * cmask, axis=1, keepdims=True) * inv_n    # (4, 1)
    cen = (conv - mean) * cmask
    var = jnp.sum(cen * cen, axis=1, keepdims=True) * inv_n        # (4, 1)
    z_ref[...] = jnp.maximum((conv - mean) * jax.lax.rsqrt(var + EPS), 0.0)

    # ---- MaxPool2d(2,2): max of four lane-shifted full-width slices --------
    # pooled value for output (b,oi,oj) lands at lane b*361 + 2*oi*19 + 2*oj.
    pooled = jnp.maximum(
        jnp.maximum(z_ref[:, 0:POOL_L], z_ref[:, 1:POOL_L + 1]),
        jnp.maximum(z_ref[:, PP:POOL_L + PP], z_ref[:, PP + 1:POOL_L + PP + 1]))

    # ---- cnn_attention MLP: Linear(4,32) -> LeakyReLU -> Linear(32,1) -------
    w1t = w_ref[0:MLP, 4:4 + CCNN]                                 # (32, 4)
    b1 = w_ref[0:MLP, 8:9]                                         # (32, 1)
    hmid = jnp.dot(w1t, pooled, preferred_element_type=jnp.float32) + b1
    hmid = jnp.maximum(hmid, NEG_SLOPE * hmid)                     # LeakyReLU
    w2t = w_ref[R_W2:R_W2 + 1, 0:MLP]                              # (1, 32)
    b2 = w_ref[R_W2:R_W2 + 1, MLP:MLP + 1]                         # (1, 1)
    s = jnp.dot(w2t, hmid, preferred_element_type=jnp.float32) + b2  # (1, 768)

    # ---- per-batch softmax over that batch's 64 pool-valid lanes ------------
    att = jnp.zeros((1, POOL_L), jnp.float32)
    for b in range(B):                                             # static tiny loop
        pmask = slab_ref[5 + b:6 + b, 0:POOL_L] > 0.0
        sb = jnp.where(pmask, s, -jnp.inf)
        mb = jnp.max(sb, axis=1, keepdims=True)
        eb = jnp.exp(sb - mb)                                      # 0 off this segment
        att = att + eb / jnp.sum(eb, axis=1, keepdims=True)        # exact divide
    att_ref[...] = att                                             # lane-dense (1,768)


def run_attention_kernel(slab, w_packed):
    # TODO(synk): for batch sizes far beyond the toy B=2, add a leading
    # "parallel" grid axis over batch (weights spec with a constant index_map)
    # so v7x's second TensorCore is used; at this size one grid step is cheaper
    # than the per-step overhead.
    return pl.pallas_call(
        _attention_kernel,
        out_shape=jax.ShapeDtypeStruct((1, POOL_L), jnp.float32),
        grid=(1,),
        in_specs=[pl.BlockSpec((8, SLAB_L), lambda i: (0, 0)),
                  pl.BlockSpec((W_ROWS, W_COLS), lambda i: (0, 0))],
        out_specs=pl.BlockSpec((1, POOL_L), lambda i: (0, 0)),
        scratch_shapes=[pltpu.VMEM((CCNN, CONV_L), jnp.float32)],
        compiler_params=pltpu.CompilerParams(
            dimension_semantics=("arbitrary",)),
    )(slab, w_packed)


# --------------------------------- glue --------------------------------------
def make_patch(scene, last_pos):
    """Patch_gen.get_patch: crop a (2G+1)^2 window centered at last_pos/scale,
    map pixels to [-1,1), append a one-hot center channel.  Returns NHWC."""
    scale = 1.0 / IMG_SCALING
    centers = (last_pos * scale).astype(jnp.int32)   # (x, y), trunc like .astype(int)

    def crop_one(img, c):
        xc, yc = c[0], c[1]
        # TODO(synk): PIL .crop zero-fills out-of-bounds regions; dynamic_slice
        # clamps instead — example positions are kept strictly in-bounds.
        return jax.lax.dynamic_slice(img, (yc - G, xc - G, 0), (P, P, 3))

    cropped = jax.vmap(crop_one)(scene, centers)      # (B, P, P, 3)
    cropped = -1.0 + cropped * 2.0 / 256.0
    pos = jnp.zeros((B, P, P, 1), jnp.float32).at[:, G, G, 0].set(1.0)
    return jnp.concatenate([cropped, pos], axis=-1)   # (B, P, P, 4) NHWC


def pack_weights(params):
    """Pack conv + MLP weights into one dense (48,128) buffer.  Called ONCE per
    parameter set (outside the jitted per-call path) and cached by the caller."""
    w = np.zeros((W_ROWS, W_COLS), np.float32)
    wc = np.asarray(params["wc"], np.float32)          # (Cout, Cin, 3, 3)
    for t in range(9):
        dy, dx = divmod(t, 3)
        w[4 * t:4 * t + CCNN, 0:CIN] = wc[:, :, dy, dx]
    # conv bias intentionally NOT packed: training-mode BN cancels it exactly.
    w[0:MLP, 4:4 + CCNN] = np.asarray(params["w1"], np.float32).T   # (32, 4)
    w[0:MLP, 8] = np.asarray(params["b1"], np.float32)
    w[R_W2, 0:MLP] = np.asarray(params["w2"], np.float32)[:, 0]
    w[R_W2, MLP] = float(np.asarray(params["b2"], np.float32)[0])
    return jnp.asarray(w)


def init_params(key):
    k1, k2, k3, k4, k5 = jax.random.split(key, 5)
    # Conv2d(4, 4, 3, 1, 1): kaiming-style init (relu), bias filled with 0.01
    wc = jax.random.normal(k1, (CCNN, CIN, 3, 3), jnp.float32) * np.sqrt(2.0 / (CIN * 9))
    bc = jnp.full((CCNN,), 0.01, jnp.float32)
    # cnn_attention: Linear(4,32) + LeakyReLU, Linear(32,1)
    w1 = jax.random.normal(k2, (CCNN, MLP), jnp.float32) * np.sqrt(1.0 / CCNN)
    b1 = jax.random.normal(k3, (MLP,), jnp.float32) * 0.05
    w2 = jax.random.normal(k4, (MLP, 1), jnp.float32) * np.sqrt(1.0 / MLP)
    b2 = jax.random.normal(k5, (1,), jnp.float32) * 0.05
    return dict(wc=wc, bc=bc, w1=w1, b1=b1, w2=w2, b2=b2)


def attention_routing_forward(scene, last_pos, h, w_packed, noise_key):
    """Returns (x, attention_vec, img_patch, noise) like the torch forward.
    w_packed is the cached pack_weights(params) buffer."""
    del h  # need_decoder=False -> the trajectory hidden state is never used
    img_nhwc = make_patch(scene, last_pos)
    img_patch = jnp.transpose(img_nhwc, (0, 3, 1, 2))             # NCHW like torch

    # Channels-on-sublanes slab: zero-padded patch, lane = b*361 + i*19 + j,
    # lanes >= 722 exactly zero; constant mask rows appended below.
    xpad = jnp.pad(img_patch, ((0, 0), (0, 0), (1, 1), (1, 1)))   # (B, 4, 19, 19)
    data = jnp.transpose(xpad, (1, 0, 2, 3)).reshape(CIN, NDATA)  # (4, 722)
    data = jnp.pad(data, ((0, 0), (0, SLAB_L - NDATA)))           # (4, 1024)
    slab = jnp.concatenate([data, jnp.asarray(_MASK_ROWS)], axis=0)  # (8, 1024)

    att = run_attention_kernel(slab, w_packed)                    # (1, 768)
    att_grid = att[0, :NDATA].reshape(B, PP, PP)
    attention_vec = att_grid[:, 0:2 * HO:2, 0:2 * HO:2].reshape(1, B, NPOS)
    noise = jax.random.normal(noise_key, (1, B, NOISE), jnp.float32)
    x = jnp.concatenate([attention_vec, noise], axis=2)           # (1, B, NPOS+NOISE)
    return x, attention_vec, img_patch, noise


# --------------------------- pure-JAX reference -------------------------------
def reference_attention(scene, last_pos, params):
    # TODO(synk): BN is training-mode (biased batch stats, gamma=1, beta=0) as in
    # a freshly initialized torch module; eval-mode running stats not represented.
    img = make_patch(scene, last_pos)                             # NHWC
    rhs = jnp.transpose(params["wc"], (2, 3, 1, 0))               # HWIO
    conv = jax.lax.conv_general_dilated(
        img, rhs, window_strides=(1, 1), padding=((1, 1), (1, 1)),
        dimension_numbers=("NHWC", "HWIO", "NHWC")) + params["bc"]
    mean = conv.mean(axis=(0, 1, 2), keepdims=True)
    var = ((conv - mean) ** 2).mean(axis=(0, 1, 2), keepdims=True)
    z = jnp.maximum((conv - mean) / jnp.sqrt(var + EPS), 0.0)
    pooled = jax.lax.reduce_window(z, -jnp.inf, jax.lax.max,
                                   (1, 2, 2, 1), (1, 2, 2, 1), "VALID")
    feats = pooled.reshape(B, NPOS, CCNN)
    hm = feats @ params["w1"] + params["b1"]
    hm = jnp.where(hm > 0, hm, NEG_SLOPE * hm)
    s = hm @ params["w2"] + params["b2"]
    return jax.nn.softmax(s, axis=1)[..., 0]                      # (B, NPOS)


# ---------------------------------- main --------------------------------------
if __name__ == "__main__":
    key = jax.random.PRNGKey(0)
    k_scene, k_pos, k_h, k_param, k_noise = jax.random.split(key, 5)

    S = 64
    scene = jax.random.uniform(k_scene, (B, S, S, 3), jnp.float32, 0.0, 255.0)
    # keep crops in-bounds: center = last_pos / img_scaling in [12, 48]
    last_pos = jax.random.uniform(k_pos, (B, 2), jnp.float32, 3.0, 12.0)
    h = jax.random.normal(k_h, (B, DEC_H), jnp.float32)           # unused (as in torch)
    params = init_params(k_param)
    w_packed = pack_weights(params)   # cached; recompute only when params change

    fwd = jax.jit(attention_routing_forward)
    x, attention_vec, img_patch, noise = fwd(scene, last_pos, h, w_packed, k_noise)
    jax.block_until_ready((x, attention_vec, img_patch, noise))

    assert x.shape == (1, B, NPOS + NOISE)
    assert attention_vec.shape == (1, B, NPOS)
    assert img_patch.shape == (B, CIN, P, P)
    assert noise.shape == (1, B, NOISE)

    ref = reference_attention(scene, last_pos, params)
    if not np.allclose(np.asarray(attention_vec[0]), np.asarray(ref),
                       atol=1e-3, rtol=1e-2):
        raise AssertionError("Pallas kernel disagrees with pure-JAX reference")

    print("KERNEL_OK")
</pallas_src>

<mosaic_0001>
module attributes {stable_mosaic.version = 11 : i64} {
  func.func @_attention_kernel(%arg0: i32, %arg1: memref<8x1024xf32, #tpu.memory_space<vmem>>, %arg2: memref<48x128xf32, #tpu.memory_space<vmem>>, %arg3: memref<1x768xf32, #tpu.memory_space<vmem>>, %arg4: memref<4x896xf32, #tpu.memory_space<vmem>>) attributes {dimension_semantics = [#tpu.dimension_semantics<arbitrary>], iteration_bounds = array<i64: 1>, scalar_prefetch = 0 : i64, scratch_operands = 1 : i64, tpu.core_type = #tpu.core_type<tc>, window_params = [{pipeline_mode = #tpu.pipeline_mode<synchronous>, transform_indices = @transform_0, window_bounds = array<i64: 8, 1024>}, {pipeline_mode = #tpu.pipeline_mode<synchronous>, transform_indices = @transform_1, window_bounds = array<i64: 48, 128>}, {pipeline_mode = #tpu.pipeline_mode<synchronous>, transform_indices = @transform_2, window_bounds = array<i64: 1, 768>}]} {
    %c0 = arith.constant 0 : index
    %c0_0 = arith.constant 0 : index
    %0 = vector.load %arg1[%c0, %c0_0] : memref<8x1024xf32, #tpu.memory_space<vmem>>, vector<4x896xf32>
    %c0_1 = arith.constant 0 : index
    %c0_2 = arith.constant 0 : index
    %1 = vector.load %arg2[%c0_1, %c0_2] : memref<48x128xf32, #tpu.memory_space<vmem>>, vector<4x4xf32>
    %cst = arith.constant dense<0.000000e+00> : vector<4x896xf32>
    %2 = tpu.matmul %1, %0, %cst {dimension_numbers = #tpu.dot_dimension_numbers<[1], [0], [0], [1], [0, 0, 1, 1], [], []>} : vector<4x4xf32>, vector<4x896xf32>, vector<4x896xf32> -> vector<4x896xf32>
    %c0_3 = arith.constant 0 : index
    %c1 = arith.constant 1 : index
    %3 = vector.load %arg1[%c0_3, %c1] : memref<8x1024xf32, #tpu.memory_space<vmem>>, vector<4x896xf32>
    %c4 = arith.constant 4 : index
    %c0_4 = arith.constant 0 : index
    %4 = vector.load %arg2[%c4, %c0_4] : memref<48x128xf32, #tpu.memory_space<vmem>>, vector<4x4xf32>
    %cst_5 = arith.constant dense<0.000000e+00> : vector<4x896xf32>
    %5 = tpu.matmul %4, %3, %cst_5 {dimension_numbers = #tpu.dot_dimension_numbers<[1], [0], [0], [1], [0, 0, 1, 1], [], []>} : vector<4x4xf32>, vector<4x896xf32>, vector<4x896xf32> -> vector<4x896xf32>
    %6 = arith.addf %2, %5 : vector<4x896xf32>
    %c0_6 = arith.constant 0 : index
    %c2 = arith.constant 2 : index
    %7 = vector.load %arg1[%c0_6, %c2] : memref<8x1024xf32, #tpu.memory_space<vmem>>, vector<4x896xf32>
    %c8 = arith.constant 8 : index
    %c0_7 = arith.constant 0 : index
    %8 = vector.load %arg2[%c8, %c0_7] : memref<48x128xf32, #tpu.memory_space<vmem>>, vector<4x4xf32>
    %cst_8 = arith.constant dense<0.000000e+00> : vector<4x896xf32>
    %9 = tpu.matmul %8, %7, %cst_8 {dimension_numbers = #tpu.dot_dimension_numbers<[1], [0], [0], [1], [0, 0, 1, 1], [], []>} : vector<4x4xf32>, vector<4x896xf32>, vector<4x896xf32> -> vector<4x896xf32>
    %10 = arith.addf %6, %9 : vector<4x896xf32>
    %c0_9 = arith.constant 0 : index
    %c19 = arith.constant 19 : index
    %11 = vector.load %arg1[%c0_9, %c19] : memref<8x1024xf32, #tpu.memory_space<vmem>>, vector<4x896xf32>
    %c12 = arith.constant 12 : index
    %c0_10 = arith.constant 0 : index
    %12 = vector.load %arg2[%c12, %c0_10] : memref<48x128xf32, #tpu.memory_space<vmem>>, vector<4x4xf32>
    %cst_11 = arith.constant dense<0.000000e+00> : vector<4x896xf32>
    %13 = tpu.matmul %12, %11, %cst_11 {dimension_numbers = #tpu.dot_dimension_numbers<[1], [0], [0], [1], [0, 0, 1, 1], [], []>} : vector<4x4xf32>, vector<4x896xf32>, vector<4x896xf32> -> vector<4x896xf32>
    %14 = arith.addf %10, %13 : vector<4x896xf32>
    %c0_12 = arith.constant 0 : index
    %c20 = arith.constant 20 : index
    %15 = vector.load %arg1[%c0_12, %c20] : memref<8x1024xf32, #tpu.memory_space<vmem>>, vector<4x896xf32>
    %c16 = arith.constant 16 : index
    %c0_13 = arith.constant 0 : index
    %16 = vector.load %arg2[%c16, %c0_13] : memref<48x128xf32, #tpu.memory_space<vmem>>, vector<4x4xf32>
    %cst_14 = arith.constant dense<0.000000e+00> : vector<4x896xf32>
    %17 = tpu.matmul %16, %15, %cst_14 {dimension_numbers = #tpu.dot_dimension_numbers<[1], [0], [0], [1], [0, 0, 1, 1], [], []>} : vector<4x4xf32>, vector<4x896xf32>, vector<4x896xf32> -> vector<4x896xf32>
    %18 = arith.addf %14, %17 : vector<4x896xf32>
    %c0_15 = arith.constant 0 : index
    %c21 = arith.constant 21 : index
    %19 = vector.load %arg1[%c0_15, %c21] : memref<8x1024xf32, #tpu.memory_space<vmem>>, vector<4x896xf32>
    %c20_16 = arith.constant 20 : index
    %c0_17 = arith.constant 0 : index
    %20 = vector.load %arg2[%c20_16, %c0_17] : memref<48x128xf32, #tpu.memory_space<vmem>>, vector<4x4xf32>
    %cst_18 = arith.constant dense<0.000000e+00> : vector<4x896xf32>
    %21 = tpu.matmul %20, %19, %cst_18 {dimension_numbers = #tpu.dot_dimension_numbers<[1], [0], [0], [1], [0, 0, 1, 1], [], []>} : vector<4x4xf32>, vector<4x896xf32>, vector<4x896xf32> -> vector<4x896xf32>
    %22 = arith.addf %18, %21 : vector<4x896xf32>
    %c0_19 = arith.constant 0 : index
    %c38 = arith.constant 38 : index
    %23 = vector.load %arg1[%c0_19, %c38] : memref<8x1024xf32, #tpu.memory_space<vmem>>, vector<4x896xf32>
    %c24 = arith.constant 24 : index
    %c0_20 = arith.constant 0 : index
    %24 = vector.load %arg2[%c24, %c0_20] : memref<48x128xf32, #tpu.memory_space<vmem>>, vector<4x4xf32>
    %cst_21 = arith.constant dense<0.000000e+00> : vector<4x896xf32>
    %25 = tpu.matmul %24, %23, %cst_21 {dimension_numbers = #tpu.dot_dimension_numbers<[1], [0], [0], [1], [0, 0, 1, 1], [], []>} : vector<4x4xf32>, vector<4x896xf32>, vector<4x896xf32> -> vector<4x896xf32>
    %26 = arith.addf %22, %25 : vector<4x896xf32>
    %c0_22 = arith.constant 0 : index
    %c39 = arith.constant 39 : index
    %27 = vector.load %arg1[%c0_22, %c39] : memref<8x1024xf32, #tpu.memory_space<vmem>>, vector<4x896xf32>
    %c28 = arith.constant 28 : index
    %c0_23 = arith.constant 0 : index
    %28 = vector.load %arg2[%c28, %c0_23] : memref<48x128xf32, #tpu.memory_space<vmem>>, vector<4x4xf32>
    %cst_24 = arith.constant dense<0.000000e+00> : vector<4x896xf32>
    %29 = tpu.matmul %28, %27, %cst_24 {dimension_numbers = #tpu.dot_dimension_numbers<[1], [0], [0], [1], [0, 0, 1, 1], [], []>} : vector<4x4xf32>, vector<4x896xf32>, vector<4x896xf32> -> vector<4x896xf32>
    %30 = arith.addf %26, %29 : vector<4x896xf32>
    %c0_25 = arith.constant 0 : index
    %c40 = arith.constant 40 : index
    %31 = vector.load %arg1[%c0_25, %c40] : memref<8x1024xf32, #tpu.memory_space<vmem>>, vector<4x896xf32>
    %c32 = arith.constant 32 : index
    %c0_26 = arith.constant 0 : index
    %32 = vector.load %arg2[%c32, %c0_26] : memref<48x128xf32, #tpu.memory_space<vmem>>, vector<4x4xf32>
    %cst_27 = arith.constant dense<0.000000e+00> : vector<4x896xf32>
    %33 = tpu.matmul %32, %31, %cst_27 {dimension_numbers = #tpu.dot_dimension_numbers<[1], [0], [0], [1], [0, 0, 1, 1], [], []>} : vector<4x4xf32>, vector<4x896xf32>, vector<4x896xf32> -> vector<4x896xf32>
    %34 = arith.addf %30, %33 : vector<4x896xf32>
    %c4_28 = arith.constant 4 : index
    %c0_29 = arith.constant 0 : index
    %35 = vector.load %arg1[%c4_28, %c0_29] : memref<8x1024xf32, #tpu.memory_space<vmem>>, vector<1x896xf32>
    %36 = vector.broadcast %35 : vector<1x896xf32> to vector<4x896xf32>
    %37 = arith.mulf %34, %36 : vector<4x896xf32>
    %cst_30 = arith.constant dense<0.000000e+00> : vector<4xf32>
    %38 = vector.multi_reduction <add>, %37, %cst_30 [1] : vector<4x896xf32> to vector<4xf32>
    %39 = vector.shape_cast %38 : vector<4xf32> to vector<4x1xf32>
    %cst_31 = arith.constant 0.00173010386 : f32
    %40 = vector.broadcast %cst_31 : f32 to vector<4x1xf32>
    %41 = arith.mulf %39, %40 : vector<4x1xf32>
    %42 = vector.broadcast %41 : vector<4x1xf32> to vector<4x896xf32>
    %43 = arith.subf %34, %42 : vector<4x896xf32>
    %44 = vector.broadcast %35 : vector<1x896xf32> to vector<4x896xf32>
    %45 = arith.mulf %43, %44 : vector<4x896xf32>
    %46 = arith.mulf %45, %45 : vector<4x896xf32>
    %cst_32 = arith.constant dense<0.000000e+00> : vector<4xf32>
    %47 = vector.multi_reduction <add>, %46, %cst_32 [1] : vector<4x896xf32> to vector<4xf32>
    %48 = vector.shape_cast %47 : vector<4xf32> to vector<4x1xf32>
    %cst_33 = arith.constant 0.00173010386 : f32
    %49 = vector.broadcast %cst_33 : f32 to vector<4x1xf32>
    %50 = arith.mulf %48, %49 : vector<4x1xf32>
    %51 = vector.broadcast %41 : vector<4x1xf32> to vector<4x896xf32>
    %52 = arith.subf %34, %51 : vector<4x896xf32>
    %cst_34 = arith.constant 9.99999974E-6 : f32
    %53 = vector.broadcast %cst_34 : f32 to vector<4x1xf32>
    %54 = arith.addf %50, %53 : vector<4x1xf32>
    %55 = math.rsqrt %54 : vector<4x1xf32>
    %56 = vector.broadcast %55 : vector<4x1xf32> to vector<4x896xf32>
    %57 = arith.mulf %52, %56 : vector<4x896xf32>
    %cst_35 = arith.constant 0.000000e+00 : f32
    %58 = vector.broadcast %cst_35 : f32 to vector<4x896xf32>
    %59 = arith.maximumf %57, %58 : vector<4x896xf32>
    %c0_36 = arith.constant 0 : index
    %c0_37 = arith.constant 0 : index
    %60 = vector.load %arg4[%c0_36, %c0_37] : memref<4x896xf32, #tpu.memory_space<vmem>>, vector<4x896xf32>
    tpu.vector_store %arg4[%c0_36, %c0_37], %59 {strides = array<i32>} : memref<4x896xf32, #tpu.memory_space<vmem>>, vector<4x896xf32>,
    %c0_38 = arith.constant 0 : index
    %c0_39 = arith.constant 0 : index
    %61 = vector.load %arg4[%c0_38, %c0_39] : memref<4x896xf32, #tpu.memory_space<vmem>>, vector<4x768xf32>
    %c0_40 = arith.constant 0 : index
    %c1_41 = arith.constant 1 : index
    %62 = vector.load %arg4[%c0_40, %c1_41] : memref<4x896xf32, #tpu.memory_space<vmem>>, vector<4x768xf32>
    %63 = arith.maximumf %61, %62 : vector<4x768xf32>
    %c0_42 = arith.constant 0 : index
    %c19_43 = arith.constant 19 : index
    %64 = vector.load %arg4[%c0_42, %c19_43] : memref<4x896xf32, #tpu.memory_space<vmem>>, vector<4x768xf32>
    %c0_44 = arith.constant 0 : index
    %c20_45 = arith.constant 20 : index
    %65 = vector.load %arg4[%c0_44, %c20_45] : memref<4x896xf32, #tpu.memory_space<vmem>>, vector<4x768xf32>
    %66 = arith.maximumf %64, %65 : vector<4x768xf32>
    %67 = arith.maximumf %63, %66 : vector<4x768xf32>
    %c0_46 = arith.constant 0 : index
    %c4_47 = arith.constant 4 : index
    %68 = vector.load %arg2[%c0_46, %c4_47] : memref<48x128xf32, #tpu.memory_space<vmem>>, vector<32x4xf32>
    %c0_48 = arith.constant 0 : index
    %c8_49 = arith.constant 8 : index
    %69 = vector.load %arg2[%c0_48, %c8_49] : memref<48x128xf32, #tpu.memory_space<vmem>>, vector<32x1xf32>
    %cst_50 = arith.constant dense<0.000000e+00> : vector<32x768xf32>
    %70 = tpu.matmul %68, %67, %cst_50 {dimension_numbers = #tpu.dot_dimension_numbers<[1], [0], [0], [1], [0, 0, 1, 1], [], []>} : vector<32x4xf32>, vector<4x768xf32>, vector<32x768xf32> -> vector<32x768xf32>
    %71 = vector.broadcast %69 : vector<32x1xf32> to vector<32x768xf32>
    %72 = arith.addf %70, %71 : vector<32x768xf32>
    %cst_51 = arith.constant 0.00999999977 : f32
    %73 = vector.broadcast %cst_51 : f32 to vector<32x768xf32>
    %74 = arith.mulf %73, %72 : vector<32x768xf32>
    %75 = arith.maximumf %72, %74 : vector<32x768xf32>
    %c40_52 = arith.constant 40 : index
    %c0_53 = arith.constant 0 : index
    %76 = vector.load %arg2[%c40_52, %c0_53] : memref<48x128xf32, #tpu.memory_space<vmem>>, vector<1x32xf32>
    %c40_54 = arith.constant 40 : index
    %c32_55 = arith.constant 32 : index
    %77 = vector.load %arg2[%c40_54, %c32_55] : memref<48x128xf32, #tpu.memory_space<vmem>>, vector<1x1xf32>
    %cst_56 = arith.constant dense<0.000000e+00> : vector<1x768xf32>
    %78 = tpu.matmul %76, %75, %cst_56 {dimension_numbers = #tpu.dot_dimension_numbers<[1], [0], [0], [1], [0, 0, 1, 1], [], []>} : vector<1x32xf32>, vector<32x768xf32>, vector<1x768xf32> -> vector<1x768xf32>
    %79 = vector.broadcast %77 : vector<1x1xf32> to vector<1x768xf32>
    %80 = arith.addf %78, %79 : vector<1x768xf32>
    %cst_57 = arith.constant 0.000000e+00 : f32
    %81 = vector.broadcast %cst_57 : f32 to vector<1x768xf32>
    %c5 = arith.constant 5 : index
    %c0_58 = arith.constant 0 : index
    %82 = vector.load %arg1[%c5, %c0_58] : memref<8x1024xf32, #tpu.memory_space<vmem>>, vector<1x768xf32>
    %cst_59 = arith.constant 0.000000e+00 : f32
    %83 = vector.broadcast %cst_59 : f32 to vector<1x768xf32>
    %84 = arith.cmpf ogt, %82, %83 : vector<1x768xf32>
    %cst_60 = arith.constant 0xFF800000 : f32
    %85 = vector.broadcast %cst_60 : f32 to vector<1x768xf32>
    %86 = arith.select %84, %80, %85 : vector<1x768xi1>, vector<1x768xf32>
    %cst_61 = arith.constant dense<0xFF800000> : vector<1xf32>
    %87 = vector.multi_reduction <maximumf>, %86, %cst_61 [1] : vector<1x768xf32> to vector<1xf32>
    %88 = vector.shape_cast %87 : vector<1xf32> to vector<1x1xf32>
    %89 = vector.broadcast %88 : vector<1x1xf32> to vector<1x768xf32>
    %90 = arith.subf %86, %89 : vector<1x768xf32>
    %91 = math.exp %90 : vector<1x768xf32>
    %cst_62 = arith.constant dense<0.000000e+00> : vector<1xf32>
    %92 = vector.multi_reduction <add>, %91, %cst_62 [1] : vector<1x768xf32> to vector<1xf32>
    %93 = vector.shape_cast %92 : vector<1xf32> to vector<1x1xf32>
    %94 = vector.broadcast %93 : vector<1x1xf32> to vector<1x768xf32>
    %95 = arith.divf %91, %94 : vector<1x768xf32>
    %96 = arith.addf %81, %95 : vector<1x768xf32>
    %c6 = arith.constant 6 : index
    %c0_63 = arith.constant 0 : index
    %97 = vector.load %arg1[%c6, %c0_63] : memref<8x1024xf32, #tpu.memory_space<vmem>>, vector<1x768xf32>
    %cst_64 = arith.constant 0.000000e+00 : f32
    %98 = vector.broadcast %cst_64 : f32 to vector<1x768xf32>
    %99 = arith.cmpf ogt, %97, %98 : vector<1x768xf32>
    %cst_65 = arith.constant 0xFF800000 : f32
    %100 = vector.broadcast %cst_65 : f32 to vector<1x768xf32>
    %101 = arith.select %99, %80, %100 : vector<1x768xi1>, vector<1x768xf32>
    %cst_66 = arith.constant dense<0xFF800000> : vector<1xf32>
    %102 = vector.multi_reduction <maximumf>, %101, %cst_66 [1] : vector<1x768xf32> to vector<1xf32>
    %103 = vector.shape_cast %102 : vector<1xf32> to vector<1x1xf32>
    %104 = vector.broadcast %103 : vector<1x1xf32> to vector<1x768xf32>
    %105 = arith.subf %101, %104 : vector<1x768xf32>
    %106 = math.exp %105 : vector<1x768xf32>
    %cst_67 = arith.constant dense<0.000000e+00> : vector<1xf32>
    %107 = vector.multi_reduction <add>, %106, %cst_67 [1] : vector<1x768xf32> to vector<1xf32>
    %108 = vector.shape_cast %107 : vector<1xf32> to vector<1x1xf32>
    %109 = vector.broadcast %108 : vector<1x1xf32> to vector<1x768xf32>
    %110 = arith.divf %106, %109 : vector<1x768xf32>
    %111 = arith.addf %96, %110 : vector<1x768xf32>
    %c0_68 = arith.constant 0 : index
    %c0_69 = arith.constant 0 : index
    %112 = vector.load %arg3[%c0_68, %c0_69] : memref<1x768xf32, #tpu.memory_space<vmem>>, vector<1x768xf32>
    tpu.vector_store %arg3[%c0_68, %c0_69], %111 {strides = array<i32>} : memref<1x768xf32, #tpu.memory_space<vmem>>, vector<1x768xf32>,
    return
  }
  func.func @transform_0(%arg0: i32) -> (i32, i32) {
    %c0_i32 = arith.constant 0 : i32
    %c0_i32_0 = arith.constant 0 : i32
    %c0_i32_1 = arith.constant 0 : i32
    return %c0_i32, %c0_i32_0 : i32, i32
  }
  func.func @transform_1(%arg0: i32) -> (i32, i32) {
    %c0_i32 = arith.constant 0 : i32
    %c0_i32_0 = arith.constant 0 : i32
    %c0_i32_1 = arith.constant 0 : i32
    return %c0_i32, %c0_i32_0 : i32, i32
  }
  func.func @transform_2(%arg0: i32) -> (i32, i32) {
    %c0_i32 = arith.constant 0 : i32
    %c0_i32_0 = arith.constant 0 : i32
    %c0_i32_1 = arith.constant 0 : i32
    return %c0_i32, %c0_i32_0 : i32, i32
  }
}

</mosaic_0001>

<bundles_post_ra>
// kernel: custom-call
= control target key start
LH: loop header
LB: loop body
LE: loop exit
PB: predicated region body
PF: predicated region fallthrough
CT: control target
= control target key end

     0   :  { %s6_s0 = inlined_call_operand.vmem [shape: f32[2,17,17,3], index: 0, kind: output, shape index: {}]  }

// kernel: squeeze.9
= control target key start
LH: loop header
LB: loop body
LE: loop exit
PB: predicated region body
PF: predicated region fallthrough
CT: control target
= control target key end

     0   :  { %s408_s10 = smov 127   ;;  %s409_s11 = smov 122   ;;  %vm228_vm0 = vcmask 900096   ;;  %vm241_vm1 = vcmask 932864   ;;  %vm255_vm2 = vcmask 941056   ;;  %vm269_vm3 = vcmask 973824   ;;  %s746_s0 = inlined_call_operand.vmem [shape: f32[722], index: 0, kind: input, shape index: {}]   ;;  %s747_s1 = inlined_call_operand.vmem [shape: f32[2,19,19], index: 1, kind: output, shape index: {}]  }
   0x1   :  { %v293_v0 = vld [vmem:[%s746_s0 + $0x4] sm:$0x1]   ;;  %v297_v1 = vld [vmem:[%s746_s0 + $0x5] sm:$0x1]   ;;  %v301_v2 = vld [vmem:[%s746_s0 + $0x3] sm:$0x1]  }
   0x2   :  { %7 = vrot.lane.b32.xlu0 %v293_v0, %s408_s10  ;;  %21 = vrot.lane.b32.xlu1 %v297_v1, %s409_s11  ;;  %s410_s14 = smov 113   ;;  %v295_v3 = vld [vmem:[%s746_s0 + $0x1] sm:$0x1]   ;;  %v299_v4 = vld [vmem:[%s746_s0 + $0x2] sm:$0x1]   ;;  %s411_s19 = smov 123  }
   0x3   :  { %35 = vrot.lane.b32.xlu2 %v301_v2, %s410_s14  ;;  %s412_s20 = smov 118   ;;  %v40_v5 = vld [vmem:[%s746_s0] sm:$0x1]   ;;  %s413_s23 = smov 109   ;;  %v304_v6 = vld [vmem:[%s746_s0 + $0x4] sm:$0x1]  }
   0x4   :  { %v306_v7 = vld [vmem:[%s746_s0 + $0x1] sm:$0x1]   ;;  %s414_s28 = smov 108   ;;  %s415_s29 = smov 104   ;;  %v308_v8 = vld [vmem:[%s746_s0 + $0x5] sm:$0x1]  }
   0x5   :  { %s416_s3 = smov 103   ;;  %v310_v9 = vld [vmem:[%s746_s0 + $0x2] sm:$0x1]   ;;  %v312_v10 = vld [vmem:[%s746_s0 + $0x3] sm:$0x1]   ;;  %s417_s8 = smov 99  }
   0x6   :  { %s418_s9 = smov 94   ;;  %v81_v11 = vld [vmem:[%s746_s0] sm:$0x1]   ;;  %s419_s12 = smov 90   ;;  %v315_v12 = vld [vmem:[%s746_s0 + $0x4] sm:$0x1]  }
   0x7   :  { %v317_v13 = vld [vmem:[%s746_s0 + $0x1] sm:$0x1]   ;;  %s420_s17 = smov 89   ;;  %s421_s18 = smov 85   ;;  %v319_v14 = vld [vmem:[%s746_s0 + $0x5] sm:$0x1]  }
   0x8   :  { %s422_s21 = smov 84   ;;  %v321_v15 = vld [vmem:[%s746_s0 + $0x2] sm:$0x1]   ;;  %v323_v16 = vld [vmem:[%s746_s0 + $0x3] sm:$0x1]   ;;  %s423_s26 = smov 80  }
   0x9   :  { %s424_s27 = smov 75   ;;  %v122_v17 = vld [vmem:[%s746_s0] sm:$0x1]   ;;  %s425_s30 = smov 71   ;;  %v326_v18 = vld [vmem:[%s746_s0 + $0x4] sm:$0x1]  }
   0xa   :  { %14 = vrot.lane.b32.xlu0 %v295_v3, %s411_s19  ;;  %28 = vrot.lane.b32.xlu1 %v299_v4, %s412_s20  ;;  %v328_v19 = vld [vmem:[%s746_s0 + $0x1] sm:$0x1]   ;;  %s426_s6 = smov 70   ;;  %s427_s7 = smov 66   ;;  %v330_v20 = vld [vmem:[%s746_s0 + $0x5] sm:$0x1]  }
   0xb   :  { %41 = vrot.lane.b32.xlu2 %v40_v5, %s413_s23  ;;  %s428_s10 = smov 65   ;;  %v332_v21 = vld [vmem:[%s746_s0 + $0x2] sm:$0x1]   ;;  %v334_v22 = vld [vmem:[%s746_s0 + $0x3] sm:$0x1]   ;;  %s429_s15 = smov 61  }
   0xc   :  { %s430_s16 = smov 56   ;;  %v163_v23 = vld [vmem:[%s746_s0] sm:$0x1]   ;;  %v352_v24 = vld [vmem:[%s746_s0 + $0x3] sm:$0x1]   ;;  %s433_s4 = smov 14  }
   0xd   :  { %v353_v25 = vld [vmem:[%s746_s0 + $0x4] sm:$0x1]   ;;  %v238_v26 = vld [vmem:[%s746_s0] sm:$0x1]   ;;  %v356_v27 = vld [vmem:[%s746_s0 + $0x1] sm:$0x1]  }
   0xe   :  { %v229_v28 = vsel %vm228_vm0, %v353_v25, %v352_v24  ;;  %v242_v29 = vsel %vm241_vm1, %v356_v27, %v238_v26  ;;  %v359_v30 = vld [vmem:[%s746_s0 + $0x4] sm:$0x1]   ;;  %v360_v31 = vld [vmem:[%s746_s0 + $0x5] sm:$0x1]   ;;  %v363_v33 = vld [vmem:[%s746_s0 + $0x1] sm:$0x1]  }
   0xf   :  { %v256_v32 = vsel %vm255_vm2, %v360_v31, %v359_v30  ;;  %v364_v34 = vld [vmem:[%s746_s0 + $0x2] sm:$0x1]   ;;  %v368_v36 = vld [vmem:[%s746_s0 + $0x3] sm:$0x1]   ;;  %vm283_vm4 = vcmask 1014784   ;;  %s434_s13 = smov 13  }
  0x10   :  { %v367_v35 = vld [vmem:[%s746_s0 + $0x2] sm:$0x1]   ;;  %v270_v37 = vsel %vm269_vm3, %v364_v34, %v363_v33  ;;  %s435_s14 = smov 9   ;;  %v337_v39 = vld [vmem:[%s746_s0 + $0x4] sm:$0x1]   ;;  %s438_s23 = smov 47  }
  0x11   :  { %v284_v38 = vsel %vm283_vm4, %v368_v36, %v367_v35  ;;  %v339_v40 = vld [vmem:[%s746_s0 + $0x1] sm:$0x1]   ;;  %v341_v41 = vld [vmem:[%s746_s0 + $0x2] sm:$0x1]   ;;  %s439_s24 = smov 42   ;;  %vm3_vm5 = vcmask 154624  }
  0x12   :  { %48 = vrot.lane.b32.xlu0 %v304_v6, %s414_s28  ;;  %55 = vrot.lane.b32.xlu1 %v306_v7, %s415_s29  ;;  %v343_v42 = vld [vmem:[%s746_s0 + $0x3] sm:$0x1]   ;;  %v197_v43 = vld [vmem:[%s746_s0] sm:$0x1]   ;;  %vm259_vm6 = vcmask 105472   ;;  %vm262_vm7 = vcmask 154728  }
  0x13   :  { %62 = vrot.lane.b32.xlu2 %v308_v8, %s416_s3  ;;  %s432_s3 = smov 18   ;;  %v346_v44 = vld [vmem:[%s746_s0 + $0x4] sm:$0x1]   ;;  %v348_v45 = vld [vmem:[%s746_s0 + $0x1] sm:$0x1]   ;;  %vm232_vm8 = vcmask 146432  }
  0x14   :  { %v350_v46 = vld [vmem:[%s746_s0 + $0x2] sm:$0x1]   ;;  %vm235_vm9 = vcmask 154768   ;;  %vm245_vm10 = vcmask 113664   ;;  %vm248_vm11 = vcmask 154736   ;;  %vm273_vm12 = vcmask 72704  }
  0x15   :  { %vm276_vm13 = vcmask 154696   ;;  %vm287_vm14 = vcmask 31744   ;;  %vm290_vm15 = vcmask 154656  }
  0x1a   :  { %69 = vrot.lane.b32.xlu0 %v310_v9, %s417_s8  ;;  %76 = vrot.lane.b32.xlu1 %v312_v10, %s418_s9 }
  0x1b   :  { %82 = vrot.lane.b32.xlu2 %v81_v11, %s419_s12  ;;  %s444_s12 = smov 23  }
  0x22   :  { %89 = vrot.lane.b32.xlu0 %v315_v12, %s420_s17  ;;  %96 = vrot.lane.b32.xlu1 %v317_v13, %s421_s18  ;;  %s437_s18 = smov 51   ;;  %v2_v13 = vld [vmem:[%s746_s0] sm:$0x1]  }
  0x23   :  { %103 = vrot.lane.b32.xlu2 %v319_v14, %s422_s21  ;;  %4 = vst.msk [vmem:[%s747_s1] sm:$0x1] %vm3_vm5, %v2_v13  }
  0x2a   :  { %110 = vrot.lane.b32.xlu0 %v321_v15, %s423_s26  ;;  %117 = vrot.lane.b32.xlu1 %v323_v16, %s424_s27  ;;  %s431_s27 = smov 52  }
  0x2b   :  { %123 = vrot.lane.b32.xlu2 %v122_v17, %s425_s30 }
  0x32   :  { %130 = vrot.lane.b32.xlu0 %v326_v18, %s426_s6  ;;  %137 = vrot.lane.b32.xlu1 %v328_v19, %s427_s7  ;;  %s443_s7 = smov 28  }
  0x33   :  { %144 = vrot.lane.b32.xlu2 %v330_v20, %s428_s10 }
  0x3a   :  { %151 = vrot.lane.b32.xlu0 %v332_v21, %s429_s15  ;;  %158 = vrot.lane.b32.xlu1 %v334_v22, %s430_s16  ;;  %s436_s15 = smov 4  }
  0x3b   :  { %164 = vrot.lane.b32.xlu2 %v163_v23, %s431_s27  ;;  %s440_s27 = smov 37  }
  0x42   :  { %230 = vrot.lane.b32.xlu0 %v229_v28, %s432_s3  ;;  %243 = vrot.lane.b32.xlu1 %v242_v29, %s433_s4  ;;  %s441_s3 = smov 33   ;;  %s442_s4 = smov 32  }
  0x43   :  { %257 = vrot.lane.b32.xlu2 %v256_v32, %s434_s13 }
  0x4a   :  { %271 = vrot.lane.b32.xlu0 %v270_v37, %s435_s14  ;;  %285 = vrot.lane.b32.xlu1 %v284_v38, %s436_s15 }
  0x4b   :  { %171 = vrot.lane.b32.xlu2 %v337_v39, %s437_s18 }
  0x52   :  { %178 = vrot.lane.b32.xlu0 %v339_v40, %s438_s23  ;;  %185 = vrot.lane.b32.xlu1 %v341_v41, %s439_s24 }
  0x53   :  { %192 = vrot.lane.b32.xlu2 %v343_v42, %s440_s27 }
  0x5a   :  { %198 = vrot.lane.b32.xlu0 %v197_v43, %s441_s3  ;;  %205 = vrot.lane.b32.xlu1 %v346_v44, %s442_s4 }
  0x5b   :  { %212 = vrot.lane.b32.xlu2 %v348_v45, %s443_s7 }
  0x5d   :  { %v36_v47 = vpop.permute.xlu2 %35  }
  0x5e   :  { %302 = vst.msk [vmem:[%s747_s1 + $0x1a] sm:$0x1] %vm3_vm5, %v36_v47  }
  0x62   :  { %219 = vrot.lane.b32.xlu0 %v350_v46, %s444_s12 }
  0x65   :  { %v42_v48 = vpop.permute.xlu2 %41  }
  0x66   :  { %303 = vst.msk [vmem:[%s747_s1 + $0x1] sm:$0x1] %vm3_vm5, %v42_v48  }
  0x6d   :  { %v63_v49 = vpop.permute.xlu2 %62  }
  0x6e   :  { %309 = vst.msk [vmem:[%s747_s1 + $0x28] sm:$0x1] %vm3_vm5, %v63_v49  }
  0x74   :  { %v8_v50 = vpop.permute.xlu0 %7   ;;  %v22_v51 = vpop.permute.xlu1 %21  }
  0x75   :  { %294 = vst.msk [vmem:[%s747_s1 + $0x20] sm:$0x1] %vm3_vm5, %v8_v50   ;;  %v83_v52 = vpop.permute.xlu2 %82  }
  0x76   :  { %298 = vst.msk [vmem:[%s747_s1 + $0x27] sm:$0x1] %vm3_vm5, %v22_v51  }
  0x77   :  { %314 = vst.msk [vmem:[%s747_s1 + $0x2] sm:$0x1] %vm3_vm5, %v83_v52  }
  0x7c   :  { %v15_v53 = vpop.permute.xlu0 %14   ;;  %v29_v54 = vpop.permute.xlu1 %28  }
  0x7d   :  { %296 = vst.msk [vmem:[%s747_s1 + $0x7] sm:$0x1] %vm3_vm5, %v15_v53   ;;  %v104_v55 = vpop.permute.xlu2 %103  }
  0x7e   :  { %300 = vst.msk [vmem:[%s747_s1 + $0xe] sm:$0x1] %vm3_vm5, %v29_v54  }
  0x7f   :  { %320 = vst.msk [vmem:[%s747_s1 + $0x29] sm:$0x1] %vm3_vm5, %v104_v55  }
  0x84   :  { %v49_v56 = vpop.permute.xlu0 %48   ;;  %v56_v57 = vpop.permute.xlu1 %55  }
  0x85   :  { %305 = vst.msk [vmem:[%s747_s1 + $0x21] sm:$0x1] %vm3_vm5, %v49_v56   ;;  %v124_v58 = vpop.permute.xlu2 %123  }
  0x86   :  { %307 = vst.msk [vmem:[%s747_s1 + $0x8] sm:$0x1] %vm3_vm5, %v56_v57  }
  0x87   :  { %325 = vst.msk [vmem:[%s747_s1 + $0x3] sm:$0x1] %vm3_vm5, %v124_v58  }
  0x8c   :  { %v70_v59 = vpop.permute.xlu0 %69   ;;  %v77_v60 = vpop.permute.xlu1 %76  }
  0x8d   :  { %311 = vst.msk [vmem:[%s747_s1 + $0xf] sm:$0x1] %vm3_vm5, %v70_v59   ;;  %v145_v61 = vpop.permute.xlu2 %144  }
  0x8e   :  { %313 = vst.msk [vmem:[%s747_s1 + $0x1b] sm:$0x1] %vm3_vm5, %v77_v60  }
  0x8f   :  { %331 = vst.msk [vmem:[%s747_s1 + $0x2a] sm:$0x1] %vm3_vm5, %v145_v61  }
  0x94   :  { %v90_v62 = vpop.permute.xlu0 %89   ;;  %v97_v63 = vpop.permute.xlu1 %96  }
  0x95   :  { %316 = vst.msk [vmem:[%s747_s1 + $0x22] sm:$0x1] %vm3_vm5, %v90_v62   ;;  %v165_v0 = vpop.permute.xlu2 %164  }
  0x96   :  { %318 = vst.msk [vmem:[%s747_s1 + $0x9] sm:$0x1] %vm3_vm5, %v97_v63  }
  0x97   :  { %336 = vst.msk [vmem:[%s747_s1 + $0x4] sm:$0x1] %vm3_vm5, %v165_v0  }
  0x9c   :  { %v111_v1 = vpop.permute.xlu0 %110   ;;  %v118_v2 = vpop.permute.xlu1 %117  }
  0x9d   :  { %322 = vst.msk [vmem:[%s747_s1 + $0x10] sm:$0x1] %vm3_vm5, %v111_v1   ;;  %v258_v3 = vpop.permute.xlu2 %257  }
  0x9e   :  { %324 = vst.msk [vmem:[%s747_s1 + $0x1c] sm:$0x1] %vm3_vm5, %v118_v2  }
  0x9f   :  { %361 = vst.msk [vmem:[%s747_s1 + $0x26] sm:$0x1] %vm259_vm6, %v258_v3  }
  0xa0   :  { %362 = vst.msk [vmem:[%s747_s1 + $0x26] sm:$0x1] %vm262_vm7, %v258_v3  }
  0xa4   :  { %v131_v4 = vpop.permute.xlu0 %130   ;;  %v138_v5 = vpop.permute.xlu1 %137  }
  0xa5   :  { %327 = vst.msk [vmem:[%s747_s1 + $0x23] sm:$0x1] %vm3_vm5, %v131_v4   ;;  %v172_v6 = vpop.permute.xlu2 %171  }
  0xa6   :  { %329 = vst.msk [vmem:[%s747_s1 + $0xa] sm:$0x1] %vm3_vm5, %v138_v5  }
  0xa7   :  { %338 = vst.msk [vmem:[%s747_s1 + $0x24] sm:$0x1] %vm3_vm5, %v172_v6  }
  0xac   :  { %v152_v7 = vpop.permute.xlu0 %151   ;;  %v159_v8 = vpop.permute.xlu1 %158  }
  0xad   :  { %333 = vst.msk [vmem:[%s747_s1 + $0x11] sm:$0x1] %vm3_vm5, %v152_v7   ;;  %v193_v9 = vpop.permute.xlu2 %192  }
  0xae   :  { %335 = vst.msk [vmem:[%s747_s1 + $0x1d] sm:$0x1] %vm3_vm5, %v159_v8  }
  0xaf   :  { %344 = vst.msk [vmem:[%s747_s1 + $0x1e] sm:$0x1] %vm3_vm5, %v193_v9  }
  0xb4   :  { %v231_v10 = vpop.permute.xlu0 %230   ;;  %v244_v11 = vpop.permute.xlu1 %243  }
  0xb5   :  { %354 = vst.msk [vmem:[%s747_s1 + $0x1f] sm:$0x1] %vm232_vm8, %v231_v10   ;;  %v213_v12 = vpop.permute.xlu2 %212  }
  0xb6   :  { %355 = vst.msk [vmem:[%s747_s1 + $0x1f] sm:$0x1] %vm235_vm9, %v231_v10  }
  0xb7   :  { %357 = vst.msk [vmem:[%s747_s1 + $0x6] sm:$0x1] %vm245_vm10, %v244_v11  }
  0xb8   :  { %358 = vst.msk [vmem:[%s747_s1 + $0x6] sm:$0x1] %vm248_vm11, %v244_v11  }
  0xb9   :  { %349 = vst.msk [vmem:[%s747_s1 + $0xc] sm:$0x1] %vm3_vm5, %v213_v12  }
  0xbc   :  { %v272_v14 = vpop.permute.xlu0 %271   ;;  %v286_v15 = vpop.permute.xlu1 %285  }
  0xbd   :  { %365 = vst.msk [vmem:[%s747_s1 + $0xd] sm:$0x1] %vm273_vm12, %v272_v14  }
  0xbe   :  { %366 = vst.msk [vmem:[%s747_s1 + $0xd] sm:$0x1] %vm276_vm13, %v272_v14  }
  0xbf   :  { %369 = vst.msk [vmem:[%s747_s1 + $0x19] sm:$0x1] %vm287_vm14, %v286_v15  }
  0xc0   :  { %370 = vst.msk [vmem:[%s747_s1 + $0x19] sm:$0x1] %vm290_vm15, %v286_v15  }
  0xc4   :  { %v179_v16 = vpop.permute.xlu0 %178   ;;  %v186_v17 = vpop.permute.xlu1 %185  }
  0xc5   :  { %340 = vst.msk [vmem:[%s747_s1 + $0xb] sm:$0x1] %vm3_vm5, %v179_v16  }
  0xc6   :  { %342 = vst.msk [vmem:[%s747_s1 + $0x12] sm:$0x1] %vm3_vm5, %v186_v17  }
  0xcc   :  { %v199_v18 = vpop.permute.xlu0 %198   ;;  %v206_v19 = vpop.permute.xlu1 %205  }
  0xcd   :  { %345 = vst.msk [vmem:[%s747_s1 + $0x5] sm:$0x1] %vm3_vm5, %v199_v18  }
  0xce   :  { %347 = vst.msk [vmem:[%s747_s1 + $0x25] sm:$0x1] %vm3_vm5, %v206_v19  }
  0xd4   :  { %v220_v20 = vpop.permute.xlu0 %219  }
  0xd5   :  { %351 = vst.msk [vmem:[%s747_s1 + $0x18] sm:$0x1] %vm3_vm5, %v220_v20  }

// kernel: attention_routing_forward.1
= control target key start
LH: loop header
LB: loop body
LE: loop exit
PB: predicated region body
PF: predicated region fallthrough
CT: control target
= control target key end

     0   :  { %s2705_s13 = smov 127   ;;  %s2706_s26 = smov 126   ;;  %vm52_vm0 = vcmask 1039360   ;;  %vm64_vm1 = vcmask 1043456   ;;  %vm60_vm2 = vcmask 31744   ;;  %vm400_vm3 = vcmask 1031168   ;;  %s3341_s0 = inlined_call_operand.vmem [shape: f32[8,1024], index: 0, kind: input, shape index: {}]   ;;  %s3342_s1 = inlined_call_operand.vmem [shape: f32[48,128], index: 1, kind: input, shape index: {}]   ;;  %s3343_s2 = inlined_call_operand.vmem [shape: f32[1,768], index: 2, kind: output, shape index: {}]  }
   0x1   :  { %v2734_v0 = vld [vmem:[%s3341_s0 + $0x10] sm:$0xf]  ;;  %v2739_v1 = vld [vmem:[%s3341_s0] sm:$0xf]  ;;  %v2755_v3 = vld [vmem:[%s3341_s0 + $0x18] sm:$0xf] }
   0x2   :  { %40 = vrot.lane.b32.xlu0 %v2734_v0, %s2705_s13  ;;  %36 = vrot.lane.b32.xlu1 %v2739_v1, %s2705_s13  ;;  %v2748_v2 = vld [vmem:[%s3341_s0 + $0x20] sm:$0xf]  ;;  %v2760_v4 = vld [vmem:[%s3341_s0 + $0x8] sm:$0xf]  ;;  %s2707_s27 = smov 109   ;;  %s2708_s28 = smov 108  }
   0x3   :  { %44 = vrot.lane.b32.xlu2 %v2748_v2, %s2705_s13  ;;  %v2765_v5 = vld [vmem:[%s3341_s0 + $0x30] sm:$0xf]  ;;  %v2776_v6 = vld [vmem:[%s3341_s0 + $0x38] sm:$0xf]  ;;  %v2781_v7 = vld [vmem:[%s3341_s0 + $0x28] sm:$0xf] }
   0x4   :  { %s2709_s29 = smov 107   ;;  %s2710_s30 = smov 90   ;;  %v27_v20 = vld [vmem:[%s3342_s1 + $0x4] sm:$0xf]  ;;  %v11_v22 = vld [vmem:[%s3341_s0] sm:$0xf] }
   0x5   :  { %s2711_s3 = smov 89   ;;  %v15_v23 = vld [vmem:[%s3341_s0 + $0x20] sm:$0xf]  ;;  %v12_v26 = vld [vmem:[%s3341_s0 + $0x8] sm:$0xf]  ;;  %s2712_s25 = smov 88  }
   0x6   :  { %v18_v30 = vld [vmem:[%s3342_s1] sm:$0xf]  ;;  %v14_v32 = vld [vmem:[%s3341_s0 + $0x18] sm:$0xf]  ;;  %v13_v33 = vld [vmem:[%s3341_s0 + $0x10] sm:$0xf] }
   0x7   :  { %v16_v34 = vld [vmem:[%s3341_s0 + $0x28] sm:$0xf]  ;;  %v17_v35 = vld [vmem:[%s3341_s0 + $0x30] sm:$0xf]  ;;  %vm589_vm4 = vcmask 891904   ;;  %vm778_vm5 = vcmask 883712  }
   0x8   :  { %v383_v47 = vld [vmem:[%s3342_s1 + $0x8] sm:$0xf]  ;;  %v572_v58 = vld [vmem:[%s3342_s1 + $0xc] sm:$0xf]  ;;  %vm967_vm6 = vcmask 875520   ;;  %vm1156_vm7 = vcmask 736256  }
   0x9   :  { %vm1345_vm8 = vcmask 728064   ;;  %vm1534_vm9 = vcmask 719872   ;;  %s2713_s18 = smov 124   ;;  %vm2191_vm13 = vcmask 261120   ;;  %vm2330_vm14 = vcmask 1040384  }
   0xa   :  { %42 = vrot.lane.b32.xlu0 %v2755_v3, %s2705_s13  ;;  %38 = vrot.lane.b32.xlu1 %v2760_v4, %s2705_s13  ;;  %vm2334_vm15 = vcmask 1043459  }
   0xb   :  { %48 = vrot.lane.b32.xlu2 %v2765_v5, %s2705_s13 }
  0x12   :  { %50 = vrot.lane.b32.xlu0 %v2776_v6, %s2705_s13  ;;  %46 = vrot.lane.b32.xlu1 %v2781_v7, %s2705_s13 }
  0x13   :  { %384 = vrot.lane.b32.xlu2 %v2739_v1, %s2706_s26 }
  0x1a   :  { %386 = vrot.lane.b32.xlu0 %v2760_v4, %s2706_s26  ;;  %388 = vrot.lane.b32.xlu1 %v2734_v0, %s2706_s26 }
  0x1b   :  { %392 = vrot.lane.b32.xlu2 %v2748_v2, %s2706_s26 }
  0x22   :  { %394 = vrot.lane.b32.xlu0 %v2781_v7, %s2706_s26  ;;  %390 = vrot.lane.b32.xlu1 %v2755_v3, %s2706_s26 }
  0x23   :  { %396 = vrot.lane.b32.xlu2 %v2765_v5, %s2706_s26 }
  0x2a   :  { %575 = vrot.lane.b32.xlu0 %v2760_v4, %s2707_s27  ;;  %577 = vrot.lane.b32.xlu1 %v2734_v0, %s2707_s27 }
  0x2b   :  { %398 = vrot.lane.b32.xlu2 %v2776_v6, %s2706_s26 }
  0x32   :  { %579 = vrot.lane.b32.xlu0 %v2755_v3, %s2707_s27  ;;  %573 = vrot.lane.b32.xlu1 %v2739_v1, %s2707_s27 }
  0x33   :  { %583 = vrot.lane.b32.xlu2 %v2781_v7, %s2707_s27 }
  0x3a   :  { %585 = vrot.lane.b32.xlu0 %v2765_v5, %s2707_s27  ;;  %581 = vrot.lane.b32.xlu1 %v2748_v2, %s2707_s27 }
  0x3b   :  { %587 = vrot.lane.b32.xlu2 %v2776_v6, %s2707_s27 }
  0x42   :  { %766 = vrot.lane.b32.xlu0 %v2734_v0, %s2708_s28  ;;  %768 = vrot.lane.b32.xlu1 %v2755_v3, %s2708_s28 }
  0x43   :  { %762 = vrot.lane.b32.xlu2 %v2739_v1, %s2708_s28 }
  0x4a   :  { %764 = vrot.lane.b32.xlu0 %v2760_v4, %s2708_s28  ;;  %770 = vrot.lane.b32.xlu1 %v2748_v2, %s2708_s28 }
  0x4b   :  { %774 = vrot.lane.b32.xlu2 %v2765_v5, %s2708_s28 }
  0x52   :  { %776 = vrot.lane.b32.xlu0 %v2776_v6, %s2708_s28  ;;  %772 = vrot.lane.b32.xlu1 %v2781_v7, %s2708_s28 }
  0x53   :  { %951 = vrot.lane.b32.xlu2 %v2739_v1, %s2709_s29 }
  0x5a   :  { %953 = vrot.lane.b32.xlu0 %v2760_v4, %s2709_s29  ;;  %957 = vrot.lane.b32.xlu1 %v2755_v3, %s2709_s29 }
  0x5b   :  { %959 = vrot.lane.b32.xlu2 %v2748_v2, %s2709_s29 }
  0x5d   :  { %v45_v8 = vpop.permute.xlu2 %44 }
  0x62   :  { %955 = vrot.lane.b32.xlu0 %v2734_v0, %s2709_s29  ;;  %961 = vrot.lane.b32.xlu1 %v2781_v7, %s2709_s29 }
  0x63   :  { %1140 = vrot.lane.b32.xlu2 %v2739_v1, %s2710_s30 }
  0x65   :  { %v49_v9 = vpop.permute.xlu2 %48 }
  0x6a   :  { %1142 = vrot.lane.b32.xlu0 %v2760_v4, %s2710_s30  ;;  %963 = vrot.lane.b32.xlu1 %v2765_v5, %s2709_s29 }
  0x6b   :  { %1144 = vrot.lane.b32.xlu2 %v2734_v0, %s2710_s30 }
  0x6d   :  { %v2832_v10 = vpop.permute.xlu2 %384 }
  0x72   :  { %965 = vrot.lane.b32.xlu0 %v2776_v6, %s2709_s29  ;;  %1148 = vrot.lane.b32.xlu1 %v2748_v2, %s2710_s30 }
  0x73   :  { %1150 = vrot.lane.b32.xlu2 %v2781_v7, %s2710_s30 }
  0x74   :  { %v41_v11 = vpop.permute.xlu0 %40  ;;  %v37_v12 = vpop.permute.xlu1 %36 }
  0x75   :  { %v2839_v13 = vpop.permute.xlu2 %392 }
  0x7a   :  { %1146 = vrot.lane.b32.xlu0 %v2755_v3, %s2710_s30  ;;  %1152 = vrot.lane.b32.xlu1 %v2765_v5, %s2710_s30 }
  0x7b   :  { %1331 = vrot.lane.b32.xlu2 %v2760_v4, %s2711_s3 }
  0x7c   :  { %v43_v14 = vpop.permute.xlu0 %42  ;;  %v39_v15 = vpop.permute.xlu1 %38 }
  0x7d   :  { %v53_v16 = vsel %vm52_vm0, %v37_v12, %v39_v15  ;;  %v54_v17 = vsel %vm52_vm0, %v39_v15, %v41_v11  ;;  %v55_v18 = vsel %vm52_vm0, %v41_v11, %v43_v14  ;;  %v56_v19 = vsel %vm52_vm0, %v43_v14, %v45_v8  ;;  %v2856_v21 = vpop.permute.xlu2 %396 }
  0x7e   :  { %2511 = vmatpush.msk.msra.mxu0 %vm64_vm1, %v53_v16  ;;  %2513 = vmatpush.msk.msra.mxu1 %vm64_vm1, %v54_v17 }
  0x7f   :  { %2515 = vmatpush.msk.msra.mxu2 %vm64_vm1, %v55_v18  ;;  %2517 = vmatpush.msk.msra.mxu3 %vm64_vm1, %v56_v19 }
  0x80   :  { %2516 = vmatmul.msk.f32.vlgmr.msra.gmra.mxu2 %vm60_vm2, %v27_v20  ;;  %2512 = vmatmul.msk.f32.vlgmr.msra.gmra.mxu0 %vm60_vm2, %v27_v20 }
  0x81   :  { %2518 = vmatmul.msk.f32.vlgmr.msra.gmra.mxu3 %vm60_vm2, %v27_v20  ;;  %2514 = vmatmul.msk.f32.vlgmr.msra.gmra.mxu1 %vm60_vm2, %v27_v20 }
  0x82   :  { %1333 = vrot.lane.b32.xlu0 %v2734_v0, %s2711_s3  ;;  %1154 = vrot.lane.b32.xlu1 %v2776_v6, %s2710_s30 }
  0x83   :  { %2525 = vmatpush.msk.msrb.mxu3 %vm64_vm1, %v11_v22  ;;  %1335 = vrot.lane.b32.xlu2 %v2755_v3, %s2711_s3  ;;  %v950_v22 = vld [vmem:[%s3342_s1 + $0x14] sm:$0xf] }
  0x84   :  { %v51_v24 = vpop.permute.xlu0 %50  ;;  %v47_v25 = vpop.permute.xlu1 %46 }
  0x85   :  { %2533 = vmatpush.msk.msra.mxu3 %vm64_vm1, %v15_v23  ;;  %v57_v27 = vsel %vm52_vm0, %v45_v8, %v47_v25  ;;  %v58_v28 = vsel %vm52_vm0, %v47_v25, %v49_v9  ;;  %v59_v29 = vsel %vm52_vm0, %v49_v9, %v51_v24  ;;  %v399_v31 = vpop.permute.xlu2 %398 }
  0x86   :  { %2519 = vmatpush.msk.msrb.mxu0 %vm64_vm1, %v57_v27  ;;  %2521 = vmatpush.msk.msrb.mxu1 %vm64_vm1, %v58_v28  ;;  %v407_v49 = vsel %vm400_vm3, %v2856_v21, %v399_v31 }
  0x87   :  { %2523 = vmatpush.msk.msrb.mxu2 %vm64_vm1, %v59_v29 }
  0x88   :  { %2527 = vmatpush.msk.msra.mxu0 %vm64_vm1, %v12_v26  ;;  %2524 = vmatmul.msk.f32.vlgmr.msrb.gmra.mxu2 %vm60_vm2, %v27_v20 }
  0x89   :  { %2520 = vmatmul.msk.f32.vlgmr.msrb.gmra.mxu0 %vm60_vm2, %v27_v20  ;;  %2526 = vmatmul.msk.f32.vlgmr.msrb.gmra.mxu3 %vm60_vm2, %v18_v30 }
  0x8a   :  { %2522 = vmatmul.msk.f32.vlgmr.msrb.gmra.mxu1 %vm60_vm2, %v27_v20  ;;  %1329 = vrot.lane.b32.xlu0 %v2739_v1, %s2711_s3 }
  0x8b   :  { %1339 = vrot.lane.b32.xlu1 %v2781_v7, %s2711_s3  ;;  %2531 = vmatpush.msk.msra.mxu2 %vm64_vm1, %v14_v32 }
  0x8c   :  { %2529 = vmatpush.msk.msra.mxu1 %vm64_vm1, %v13_v33  ;;  %v387_v36 = vpop.permute.xlu0 %386  ;;  %v389_v37 = vpop.permute.xlu1 %388  ;;  %2535 = vmatpush.msk.msrb.mxu0 %vm64_vm1, %v16_v34 }
  0x8d   :  { %v401_v38 = vsel %vm400_vm3, %v2832_v10, %v387_v36  ;;  %v402_v39 = vsel %vm400_vm3, %v387_v36, %v389_v37  ;;  %1341 = vrot.lane.b32.xlu2 %v2765_v5, %s2711_s3  ;;  %v584_v40 = vpop.permute.xlu2 %583 }
  0x8e   :  { %2537 = vmatpush.msk.msrb.mxu1 %vm64_vm1, %v17_v35  ;;  %2539 = vmatpush.msk.msrb.mxu2 %vm64_vm1, %v401_v38 }
  0x8f   :  { %2541 = vmatpush.msk.msrb.mxu3 %vm64_vm1, %v402_v39 }
  0x90   :  { %2532 = vmatmul.msk.f32.vlgmr.msra.gmra.mxu2 %vm60_vm2, %v18_v30 }
  0x91   :  { %2528 = vmatmul.msk.f32.vlgmr.msra.gmra.mxu0 %vm60_vm2, %v18_v30  ;;  %2534 = vmatmul.msk.f32.vlgmr.msra.gmra.mxu3 %vm60_vm2, %v18_v30 }
  0x92   :  { %2530 = vmatmul.msk.f32.vlgmr.msra.gmra.mxu1 %vm60_vm2, %v18_v30  ;;  %1337 = vrot.lane.b32.xlu0 %v2748_v2, %s2711_s3 }
  0x93   :  { %1343 = vrot.lane.b32.xlu1 %v2776_v6, %s2711_s3 }
  0x94   :  { %v395_v41 = vpop.permute.xlu0 %394  ;;  %v391_v42 = vpop.permute.xlu1 %390 }
  0x95   :  { %v405_v43 = vsel %vm400_vm3, %v2839_v13, %v395_v41  ;;  %v406_v44 = vsel %vm400_vm3, %v395_v41, %v2856_v21  ;;  %v403_v45 = vsel %vm400_vm3, %v389_v37, %v391_v42  ;;  %v404_v46 = vsel %vm400_vm3, %v391_v42, %v2839_v13  ;;  %1522 = vrot.lane.b32.xlu2 %v2734_v0, %s2712_s25  ;;  %v588_v48 = vpop.permute.xlu2 %587  ;;  %v1139_v37 = vld [vmem:[%s3342_s1 + $0x18] sm:$0xf] }
  0x96   :  { %2543 = vmatpush.msk.msra.mxu0 %vm64_vm1, %v403_v45  ;;  %2545 = vmatpush.msk.msra.mxu1 %vm64_vm1, %v404_v46 }
  0x97   :  { %2547 = vmatpush.msk.msra.mxu2 %vm64_vm1, %v405_v43  ;;  %2549 = vmatpush.msk.msra.mxu3 %vm64_vm1, %v406_v44 }
  0x98   :  { %2540 = vmatmul.msk.f32.vlgmr.msrb.gmra.mxu2 %vm60_vm2, %v383_v47 }
  0x99   :  { %2536 = vmatmul.msk.f32.vlgmr.msrb.gmra.mxu0 %vm60_vm2, %v18_v30  ;;  %2542 = vmatmul.msk.f32.vlgmr.msrb.gmra.mxu3 %vm60_vm2, %v383_v47 }
  0x9a   :  { %2538 = vmatmul.msk.f32.vlgmr.msrb.gmra.mxu1 %vm60_vm2, %v18_v30  ;;  %1524 = vrot.lane.b32.xlu0 %v2755_v3, %s2712_s25 }
  0x9b   :  { %1518 = vrot.lane.b32.xlu1 %v2739_v1, %s2712_s25  ;;  %2551 = vmatpush.msk.msrb.mxu0 %vm64_vm1, %v407_v49 }
  0x9c   :  { %v576_v50 = vpop.permute.xlu0 %575  ;;  %v578_v51 = vpop.permute.xlu1 %577 }
  0x9d   :  { %v591_v52 = vsel %vm589_vm4, %v576_v50, %v578_v51  ;;  %1520 = vrot.lane.b32.xlu2 %v2760_v4, %s2712_s25  ;;  %v763_v53 = vpop.permute.xlu2 %762 }
  0x9e   :  { %2555 = vmatpush.msk.msrb.mxu2 %vm64_vm1, %v591_v52 }
  0xa0   :  { %2548 = vmatmul.msk.f32.vlgmr.msra.gmra.mxu2 %vm60_vm2, %v383_v47 }
  0xa1   :  { %2544 = vmatmul.msk.f32.vlgmr.msra.gmra.mxu0 %vm60_vm2, %v383_v47  ;;  %2550 = vmatmul.msk.f32.vlgmr.msra.gmra.mxu3 %vm60_vm2, %v383_v47 }
  0xa2   :  { %2546 = vmatmul.msk.f32.vlgmr.msra.gmra.mxu1 %vm60_vm2, %v383_v47  ;;  %1526 = vrot.lane.b32.xlu0 %v2748_v2, %s2712_s25 }
  0xa3   :  { %1530 = vrot.lane.b32.xlu1 %v2765_v5, %s2712_s25 }
  0xa4   :  { %v580_v54 = vpop.permute.xlu0 %579  ;;  %v574_v55 = vpop.permute.xlu1 %573 }
  0xa5   :  { %v592_v56 = vsel %vm589_vm4, %v578_v51, %v580_v54  ;;  %v590_v57 = vsel %vm589_vm4, %v574_v55, %v576_v50  ;;  %1532 = vrot.lane.b32.xlu2 %v2776_v6, %s2712_s25  ;;  %v775_v59 = vpop.permute.xlu2 %774  ;;  %v761_v6 = vld [vmem:[%s3342_s1 + $0x10] sm:$0xf] }
  0xa6   :  { %2553 = vmatpush.msk.msrb.mxu1 %vm64_vm1, %v590_v57  ;;  %2557 = vmatpush.msk.msrb.mxu3 %vm64_vm1, %v592_v56 }
  0xa8   :  { %2556 = vmatmul.msk.f32.vlgmr.msrb.gmra.mxu2 %vm60_vm2, %v572_v58 }
  0xa9   :  { %2552 = vmatmul.msk.f32.vlgmr.msrb.gmra.mxu0 %vm60_vm2, %v383_v47  ;;  %2558 = vmatmul.msk.f32.vlgmr.msrb.gmra.mxu3 %vm60_vm2, %v572_v58 }
  0xaa   :  { %2554 = vmatmul.msk.f32.vlgmr.msrb.gmra.mxu1 %vm60_vm2, %v572_v58  ;;  %1528 = vrot.lane.b32.xlu0 %v2781_v7, %s2712_s25 }
  0xac   :  { %v586_v60 = vpop.permute.xlu0 %585  ;;  %v582_v61 = vpop.permute.xlu1 %581 }
  0xad   :  { %v595_v62 = vsel %vm589_vm4, %v584_v40, %v586_v60  ;;  %v596_v63 = vsel %vm589_vm4, %v586_v60, %v588_v48  ;;  %v593_v0 = vsel %vm589_vm4, %v580_v54, %v582_v61  ;;  %v594_v1 = vsel %vm589_vm4, %v582_v61, %v584_v40  ;;  %v952_v2 = vpop.permute.xlu2 %951  ;;  %v1328_v54 = vld [vmem:[%s3342_s1 + $0x1c] sm:$0xf] }
  0xae   :  { %2559 = vmatpush.msk.msra.mxu0 %vm64_vm1, %v593_v0  ;;  %2561 = vmatpush.msk.msra.mxu1 %vm64_vm1, %v594_v1 }
  0xaf   :  { %2563 = vmatpush.msk.msra.mxu2 %vm64_vm1, %v595_v62  ;;  %2565 = vmatpush.msk.msra.mxu3 %vm64_vm1, %v596_v63 }
  0xb0   :  { %2564 = vmatmul.msk.f32.vlgmr.msra.gmra.mxu2 %vm60_vm2, %v572_v58 }
  0xb1   :  { %2560 = vmatmul.msk.f32.vlgmr.msra.gmra.mxu0 %vm60_vm2, %v572_v58  ;;  %2566 = vmatmul.msk.f32.vlgmr.msra.gmra.mxu3 %vm60_vm2, %v572_v58 }
  0xb2   :  { %2562 = vmatmul.msk.f32.vlgmr.msra.gmra.mxu1 %vm60_vm2, %v572_v58 }
  0xb4   :  { %v767_v3 = vpop.permute.xlu0 %766  ;;  %v769_v4 = vpop.permute.xlu1 %768 }
  0xb5   :  { %v781_v5 = vsel %vm778_vm5, %v767_v3, %v769_v4  ;;  %v960_v7 = vpop.permute.xlu2 %959 }
  0xb6   :  { %2571 = vmatpush.msk.msrb.mxu2 %vm64_vm1, %v781_v5 }
  0xb8   :  { %2572 = vmatmul.msk.f32.vlgmr.msrb.gmra.mxu2 %vm60_vm2, %v761_v6 }
  0xbc   :  { %v765_v8 = vpop.permute.xlu0 %764  ;;  %v771_v9 = vpop.permute.xlu1 %770 }
  0xbd   :  { %v779_v10 = vsel %vm778_vm5, %v763_v53, %v765_v8  ;;  %v780_v11 = vsel %vm778_vm5, %v765_v8, %v767_v3  ;;  %v782_v12 = vsel %vm778_vm5, %v769_v4, %v771_v9  ;;  %v1141_v13 = vpop.permute.xlu2 %1140 }
  0xbe   :  { %2567 = vmatpush.msk.msrb.mxu0 %vm64_vm1, %v779_v10  ;;  %2569 = vmatpush.msk.msrb.mxu1 %vm64_vm1, %v780_v11 }
  0xbf   :  { %2573 = vmatpush.msk.msrb.mxu3 %vm64_vm1, %v782_v12  ;;  %2568 = vmatmul.msk.f32.vlgmr.msrb.gmra.mxu0 %vm60_vm2, %v761_v6  ;;  %v1517_v12 = vld [vmem:[%s3342_s1 + $0x20] sm:$0xf] }
  0xc0   :  { %2570 = vmatmul.msk.f32.vlgmr.msrb.gmra.mxu1 %vm60_vm2, %v761_v6  ;;  %2574 = vmatmul.msk.f32.vlgmr.msrb.gmra.mxu3 %vm60_vm2, %v761_v6 }
  0xc4   :  { %v777_v14 = vpop.permute.xlu0 %776  ;;  %v773_v15 = vpop.permute.xlu1 %772 }
  0xc5   :  { %v785_v16 = vsel %vm778_vm5, %v775_v59, %v777_v14  ;;  %v783_v17 = vsel %vm778_vm5, %v771_v9, %v773_v15  ;;  %v784_v18 = vsel %vm778_vm5, %v773_v15, %v775_v59  ;;  %v1145_v19 = vpop.permute.xlu2 %1144 }
  0xc6   :  { %2575 = vmatpush.msk.msra.mxu0 %vm64_vm1, %v783_v17  ;;  %2577 = vmatpush.msk.msra.mxu1 %vm64_vm1, %v784_v18 }
  0xc7   :  { %2579 = vmatpush.msk.msra.mxu2 %vm64_vm1, %v785_v16  ;;  %2576 = vmatmul.msk.f32.vlgmr.msra.gmra.mxu0 %vm60_vm2, %v761_v6 }
  0xc8   :  { %2578 = vmatmul.msk.f32.vlgmr.msra.gmra.mxu1 %vm60_vm2, %v761_v6  ;;  %2580 = vmatmul.msk.f32.vlgmr.msra.gmra.mxu2 %vm60_vm2, %v761_v6 }
  0xcc   :  { %v954_v20 = vpop.permute.xlu0 %953  ;;  %v958_v21 = vpop.permute.xlu1 %957 }
  0xcd   :  { %v968_v23 = vsel %vm967_vm6, %v952_v2, %v954_v20  ;;  %v971_v24 = vsel %vm967_vm6, %v958_v21, %v960_v7  ;;  %v1151_v25 = vpop.permute.xlu2 %1150 }
  0xce   :  { %2581 = vmatpush.msk.msra.mxu3 %vm64_vm1, %v968_v23  ;;  %2587 = vmatpush.msk.msrb.mxu2 %vm64_vm1, %v971_v24 }
  0xcf   :  { %2582 = vmatmul.msk.f32.vlgmr.msra.gmra.mxu3 %vm60_vm2, %v950_v22 }
  0xd0   :  { %2588 = vmatmul.msk.f32.vlgmr.msrb.gmra.mxu2 %vm60_vm2, %v950_v22 }
  0xd4   :  { %v956_v26 = vpop.permute.xlu0 %955  ;;  %v962_v27 = vpop.permute.xlu1 %961 }
  0xd5   :  { %v969_v28 = vsel %vm967_vm6, %v954_v20, %v956_v26  ;;  %v970_v29 = vsel %vm967_vm6, %v956_v26, %v958_v21  ;;  %v972_v30 = vsel %vm967_vm6, %v960_v7, %v962_v27  ;;  %v1332_v31 = vpop.permute.xlu2 %1331 }
  0xd6   :  { %2583 = vmatpush.msk.msrb.mxu0 %vm64_vm1, %v969_v28  ;;  %2585 = vmatpush.msk.msrb.mxu1 %vm64_vm1, %v970_v29 }
  0xd7   :  { %2589 = vmatpush.msk.msrb.mxu3 %vm64_vm1, %v972_v30  ;;  %2584 = vmatmul.msk.f32.vlgmr.msrb.gmra.mxu0 %vm60_vm2, %v950_v22 }
  0xd8   :  { %2586 = vmatmul.msk.f32.vlgmr.msrb.gmra.mxu1 %vm60_vm2, %v950_v22  ;;  %2590 = vmatmul.msk.f32.vlgmr.msrb.gmra.mxu3 %vm60_vm2, %v950_v22 }
  0xdc   :  { %v1143_v32 = vpop.permute.xlu0 %1142  ;;  %v964_v33 = vpop.permute.xlu1 %963 }
  0xdd   :  { %v1157_v34 = vsel %vm1156_vm7, %v1141_v13, %v1143_v32  ;;  %v1158_v35 = vsel %vm1156_vm7, %v1143_v32, %v1145_v19  ;;  %v973_v36 = vsel %vm967_vm6, %v962_v27, %v964_v33  ;;  %v1336_v42 = vpop.permute.xlu2 %1335 }
  0xde   :  { %2591 = vmatpush.msk.msra.mxu0 %vm64_vm1, %v973_v36  ;;  %2595 = vmatpush.msk.msra.mxu2 %vm64_vm1, %v1157_v34 }
  0xdf   :  { %2597 = vmatpush.msk.msra.mxu3 %vm64_vm1, %v1158_v35  ;;  %2592 = vmatmul.msk.f32.vlgmr.msra.gmra.mxu0 %vm60_vm2, %v950_v22 }
  0xe0   :  { %2596 = vmatmul.msk.f32.vlgmr.msra.gmra.mxu2 %vm60_vm2, %v1139_v37  ;;  %2598 = vmatmul.msk.f32.vlgmr.msra.gmra.mxu3 %vm60_vm2, %v1139_v37 }
  0xe4   :  { %v966_v38 = vpop.permute.xlu0 %965  ;;  %v1149_v39 = vpop.permute.xlu1 %1148 }
  0xe5   :  { %v974_v40 = vsel %vm967_vm6, %v964_v33, %v966_v38  ;;  %v1161_v41 = vsel %vm1156_vm7, %v1149_v39, %v1151_v25 }
  0xe6   :  { %2593 = vmatpush.msk.msra.mxu1 %vm64_vm1, %v974_v40  ;;  %2603 = vmatpush.msk.msrb.mxu2 %vm64_vm1, %v1161_v41 }
  0xe7   :  { %2594 = vmatmul.msk.f32.vlgmr.msra.gmra.mxu1 %vm60_vm2, %v950_v22  ;;  %v1342_v48 = vpop.permute.xlu2 %1341 }
  0xe8   :  { %2604 = vmatmul.msk.f32.vlgmr.msrb.gmra.mxu2 %vm60_vm2, %v1139_v37 }
  0xec   :  { %v1147_v43 = vpop.permute.xlu0 %1146  ;;  %v1153_v44 = vpop.permute.xlu1 %1152 }
  0xed   :  { %v1159_v45 = vsel %vm1156_vm7, %v1145_v19, %v1147_v43  ;;  %v1160_v46 = vsel %vm1156_vm7, %v1147_v43, %v1149_v39  ;;  %v1162_v47 = vsel %vm1156_vm7, %v1151_v25, %v1153_v44 }
  0xee   :  { %2599 = vmatpush.msk.msrb.mxu0 %vm64_vm1, %v1159_v45  ;;  %2601 = vmatpush.msk.msrb.mxu1 %vm64_vm1, %v1160_v46 }
  0xef   :  { %2605 = vmatpush.msk.msrb.mxu3 %vm64_vm1, %v1162_v47  ;;  %2600 = vmatmul.msk.f32.vlgmr.msrb.gmra.mxu0 %vm60_vm2, %v1139_v37  ;;  %v1523_v55 = vpop.permute.xlu2 %1522 }
  0xf0   :  { %2602 = vmatmul.msk.f32.vlgmr.msrb.gmra.mxu1 %vm60_vm2, %v1139_v37  ;;  %2606 = vmatmul.msk.f32.vlgmr.msrb.gmra.mxu3 %vm60_vm2, %v1139_v37 }
  0xf4   :  { %v1334_v49 = vpop.permute.xlu0 %1333  ;;  %v1155_v50 = vpop.permute.xlu1 %1154 }
  0xf5   :  { %v1347_v51 = vsel %vm1345_vm8, %v1332_v31, %v1334_v49  ;;  %v1348_v52 = vsel %vm1345_vm8, %v1334_v49, %v1336_v42  ;;  %v1163_v53 = vsel %vm1156_vm7, %v1153_v44, %v1155_v50 }
  0xf6   :  { %2607 = vmatpush.msk.msra.mxu0 %vm64_vm1, %v1163_v53  ;;  %2611 = vmatpush.msk.msra.mxu2 %vm64_vm1, %v1347_v51 }
  0xf7   :  { %2613 = vmatpush.msk.msra.mxu3 %vm64_vm1, %v1348_v52  ;;  %2608 = vmatmul.msk.f32.vlgmr.msra.gmra.mxu0 %vm60_vm2, %v1139_v37  ;;  %v1521_v63 = vpop.permute.xlu2 %1520 }
  0xf8   :  { %2612 = vmatmul.msk.f32.vlgmr.msra.gmra.mxu2 %vm60_vm2, %v1328_v54  ;;  %2614 = vmatmul.msk.f32.vlgmr.msra.gmra.mxu3 %vm60_vm2, %v1328_v54  ;;  %v1536_v8 = vsel %vm1534_vm9, %v1521_v63, %v1523_v55 }
  0xfc   :  { %v1330_v56 = vpop.permute.xlu0 %1329 }
  0xfd   :  { %v1340_v57 = vpop.permute.xlu1 %1339  ;;  %v1346_v58 = vsel %vm1345_vm8, %v1330_v56, %v1332_v31  ;;  %v96_v60 = vpop.f32.mrf.mxu0 }
  0xfe   :  { %v1351_v59 = vsel %vm1345_vm8, %v1340_v57, %v1342_v48  ;;  %2609 = vmatpush.msk.msra.mxu1 %vm64_vm1, %v1346_v58  ;;  %v116_v61 = vpop.f32.mrf.mxu1 }
  0xff   :  { %2619 = vmatpush.msk.msrb.mxu2 %vm64_vm1, %v1351_v59  ;;  %2610 = vmatmul.msk.f32.vlgmr.msra.gmra.mxu1 %vm60_vm2, %v1328_v54  ;;  %v1533_v22 = vpop.permute.xlu2 %1532 }
 0x100   :  { %2620 = vmatmul.msk.f32.vlgmr.msrb.gmra.mxu2 %vm60_vm2, %v1328_v54 }
 0x103   :  { %v136_v62 = vpop.f32.mrf.mxu2 }
 0x104   :  { %v156_v0 = vpop.f32.mrf.mxu3  ;;  %v1338_v1 = vpop.permute.xlu0 %1337 }
 0x105   :  { %v1349_v2 = vsel %vm1345_vm8, %v1336_v42, %v1338_v1  ;;  %v1350_v3 = vsel %vm1345_vm8, %v1338_v1, %v1340_v57  ;;  %v1344_v4 = vpop.permute.xlu1 %1343 }
 0x106   :  { %v176_v5 = vpop.f32.mrf.mxu0  ;;  %v1352_v6 = vsel %vm1345_vm8, %v1342_v48, %v1344_v4  ;;  %2615 = vmatpush.msk.msrb.mxu0 %vm64_vm1, %v1349_v2  ;;  %2617 = vmatpush.msk.msrb.mxu1 %vm64_vm1, %v1350_v3 }
 0x107   :  { %v196_v7 = vpop.f32.mrf.mxu1  ;;  %2621 = vmatpush.msk.msrb.mxu3 %vm64_vm1, %v1352_v6  ;;  %2616 = vmatmul.msk.f32.vlgmr.msrb.gmra.mxu0 %vm60_vm2, %v1328_v54 }
 0x108   :  { %2618 = vmatmul.msk.f32.vlgmr.msrb.gmra.mxu1 %vm60_vm2, %v1328_v54  ;;  %2622 = vmatmul.msk.f32.vlgmr.msrb.gmra.mxu3 %vm60_vm2, %v1328_v54 }
 0x109   :  { %2625 = vmatpush.msk.msra.mxu1 %vm64_vm1, %v1536_v8 }
 0x10b   :  { %v216_v9 = vpop.f32.mrf.mxu2 }
 0x10c   :  { %v1525_v10 = vpop.permute.xlu0 %1524  ;;  %v260_v11 = vpop.f32.mrf.mxu3 }
 0x10d   :  { %v1537_v13 = vsel %vm1534_vm9, %v1523_v55, %v1525_v10  ;;  %v1519_v14 = vpop.permute.xlu1 %1518  ;;  %v261_v15 = vadd.f32 %v260_v11, %v96_v60 }
 0x10e   :  { %v280_v16 = vpop.f32.mrf.mxu0  ;;  %v1535_v17 = vsel %vm1534_vm9, %v1519_v14, %v1521_v63  ;;  %2627 = vmatpush.msk.msra.mxu2 %vm64_vm1, %v1537_v13 }
 0x10f   :  { %v281_v18 = vadd.f32 %v280_v16, %v116_v61  ;;  %v300_v19 = vpop.f32.mrf.mxu1  ;;  %2623 = vmatpush.msk.msra.mxu0 %vm64_vm1, %v1535_v17  ;;  %2628 = vmatmul.msk.f32.vlgmr.msra.gmra.mxu2 %vm60_vm2, %v1517_v12 }
 0x110   :  { %v301_v20 = vadd.f32 %v300_v19, %v136_v62  ;;  %2624 = vmatmul.msk.f32.vlgmr.msra.gmra.mxu0 %vm60_vm2, %v1517_v12  ;;  %2626 = vmatmul.msk.f32.vlgmr.msra.gmra.mxu1 %vm60_vm2, %v1517_v12 }
 0x113   :  { %v320_v21 = vpop.f32.mrf.mxu2 }
 0x114   :  { %v321_v23 = vadd.f32 %v320_v21, %v156_v0  ;;  %v1527_v24 = vpop.permute.xlu0 %1526  ;;  %v340_v25 = vpop.f32.mrf.mxu3 }
 0x115   :  { %v1538_v26 = vsel %vm1534_vm9, %v1525_v10, %v1527_v24  ;;  %v1531_v27 = vpop.permute.xlu1 %1530  ;;  %v341_v28 = vadd.f32 %v340_v25, %v176_v5  ;;  %v2638_v25 = vld [vmem:[%s3341_s0 + $0x4] ss:$8 sm:$0xf0] }
 0x116   :  { %v360_v29 = vpop.f32.mrf.mxu0  ;;  %v1541_v30 = vsel %vm1534_vm9, %v1531_v27, %v1533_v22  ;;  %2629 = vmatpush.msk.msra.mxu3 %vm64_vm1, %v1538_v26 }
 0x117   :  { %v361_v31 = vadd.f32 %v360_v29, %v196_v7  ;;  %v380_v32 = vpop.f32.mrf.mxu1  ;;  %2635 = vmatpush.msk.msrb.mxu2 %vm64_vm1, %v1541_v30  ;;  %2630 = vmatmul.msk.f32.vlgmr.msra.gmra.mxu3 %vm60_vm2, %v1517_v12 }
 0x118   :  { %v381_v33 = vadd.f32 %v380_v32, %v216_v9  ;;  %2636 = vmatmul.msk.f32.vlgmr.msrb.gmra.mxu2 %vm60_vm2, %v1517_v12 }
 0x11b   :  { %v442_v34 = vpop.f32.mrf.mxu2 }
 0x11c   :  { %v565_v35 = vadd.f32 %v442_v34, %v261_v15  ;;  %v1529_v36 = vpop.permute.xlu0 %1528  ;;  %v462_v37 = vpop.f32.mrf.mxu3 }
 0x11d   :  { %v1539_v38 = vsel %vm1534_vm9, %v1527_v24, %v1529_v36  ;;  %v1540_v39 = vsel %vm1534_vm9, %v1529_v36, %v1531_v27  ;;  %v566_v40 = vadd.f32 %v462_v37, %v281_v18  ;;  %v2637_v24 = vld [vmem:[%s3341_s0 + $0x4] ss:$8 sm:$0xf] }
 0x11e   :  { %v482_v41 = vpop.f32.mrf.mxu0  ;;  %2631 = vmatpush.msk.msrb.mxu0 %vm64_vm1, %v1539_v38  ;;  %2633 = vmatpush.msk.msrb.mxu1 %vm64_vm1, %v1540_v39 }
 0x11f   :  { %v567_v42 = vadd.f32 %v482_v41, %v301_v20  ;;  %v502_v43 = vpop.f32.mrf.mxu1  ;;  %2632 = vmatmul.msk.f32.vlgmr.msrb.gmra.mxu0 %vm60_vm2, %v1517_v12  ;;  %2634 = vmatmul.msk.f32.vlgmr.msrb.gmra.mxu1 %vm60_vm2, %v1517_v12 }
 0x120   :  { %v568_v44 = vadd.f32 %v502_v43, %v321_v23 }
 0x123   :  { %v522_v45 = vpop.f32.mrf.mxu2 }
 0x124   :  { %v3116_v46 = vadd.f32 %v522_v45, %v341_v28  ;;  %v542_v47 = vpop.f32.mrf.mxu3 }
 0x125   :  { %v3118_v48 = vadd.f32 %v542_v47, %v361_v31  ;;  %v3126_v31 = vor.u32 %v2638_v25, %v2637_v24 }
 0x126   :  { %v562_v49 = vpop.f32.mrf.mxu0 }
 0x127   :  { %v571_v50 = vadd.f32 %v562_v49, %v381_v33  ;;  %v631_v51 = vpop.f32.mrf.mxu1  ;;  %v1711_v41 = vperm.slane %v3126_v31, 0  ;;  %v1712_v47 = vperm.slane %v3126_v31, 1 }
 0x128   :  { %v754_v19 = vadd.f32 %v631_v51, %v565_v35 }
 0x12b   :  { %v651_v52 = vpop.f32.mrf.mxu2 }
 0x12c   :  { %v671_v55 = vpop.f32.mrf.mxu3  ;;  %v755_v20 = vadd.f32 %v651_v52, %v566_v40 }
 0x12d   :  { %v756_v21 = vadd.f32 %v671_v55, %v567_v42 }
 0x12e   :  { %v691_v53 = vpop.f32.mrf.mxu0 }
 0x12f   :  { %v711_v54 = vpop.f32.mrf.mxu1  ;;  %v757_v40 = vadd.f32 %v691_v53, %v568_v44 }
 0x130   :  { %v758_v49 = vadd.f32 %v711_v54, %v3116_v46 }
 0x133   :  { %v731_v56 = vpop.f32.mrf.mxu2 }
 0x134   :  { %v751_v59 = vpop.f32.mrf.mxu3  ;;  %v759_v51 = vadd.f32 %v731_v56, %v3118_v48 }
 0x135   :  { %v760_v52 = vadd.f32 %v751_v59, %v571_v50 }
 0x13b   :  { %v860_v60 = vpop.f32.mrf.mxu2 }
 0x13c   :  { %v820_v57 = vpop.f32.mrf.mxu0  ;;  %v945_v28 = vadd.f32 %v860_v60, %v756_v21 }
 0x13d   :  { %v840_v58 = vpop.f32.mrf.mxu1  ;;  %v943_v22 = vadd.f32 %v820_v57, %v754_v19  ;;  %v1715_v19 = vperm.slane %v3126_v31, 4 }
 0x13e   :  { %v944_v23 = vadd.f32 %v840_v58, %v755_v20 }
 0x143   :  { %v880_v63 = vpop.f32.mrf.mxu3 }
 0x144   :  { %v900_v61 = vpop.f32.mrf.mxu0  ;;  %v946_v58 = vadd.f32 %v880_v63, %v757_v40 }
 0x145   :  { %v920_v62 = vpop.f32.mrf.mxu1 }
 0x146   :  { %v948_v44 = vadd.f32 %v920_v62, %v759_v51 }
 0x14b   :  { %v940_v0 = vpop.f32.mrf.mxu2 }
 0x14c   :  { %v949_v53 = vadd.f32 %v940_v0, %v760_v52  ;;  %v1714_v0 = vperm.slane %v3126_v31, 3 }
 0x152   :  { %v1009_v3 = vpop.f32.mrf.mxu3 }
 0x153   :  { %v1069_v4 = vpop.f32.mrf.mxu2  ;;  %v1132_v29 = vadd.f32 %v1009_v3, %v943_v22 }
 0x154   :  { %v1029_v1 = vpop.f32.mrf.mxu0  ;;  %v1135_v3 = vadd.f32 %v1069_v4, %v946_v58 }
 0x155   :  { %v1049_v2 = vpop.f32.mrf.mxu1  ;;  %v1133_v30 = vadd.f32 %v1029_v1, %v944_v23  ;;  %v1713_v1 = vperm.slane %v3126_v31, 2 }
 0x156   :  { %v1134_v32 = vadd.f32 %v1049_v2, %v945_v28  ;;  %v947_v2 = vadd.f32 %v900_v61, %v758_v49 }
 0x15b   :  { %v1089_v7 = vpop.f32.mrf.mxu3 }
 0x15c   :  { %v1109_v5 = vpop.f32.mrf.mxu0  ;;  %v1136_v46 = vadd.f32 %v1089_v7, %v947_v2  ;;  %v1716_v7 = vperm.slane %v3126_v31, 5 }
 0x15d   :  { %v1137_v54 = vadd.f32 %v1109_v5, %v948_v44 }
 0x163   :  { %v1198_v8 = vpop.f32.mrf.mxu2  ;;  %v1218_v11 = vpop.f32.mrf.mxu3 }
 0x164   :  { %v1129_v6 = vpop.f32.mrf.mxu1  ;;  %v1321_v33 = vadd.f32 %v1198_v8, %v1132_v29  ;;  %v1322_v34 = vadd.f32 %v1218_v11, %v1133_v30 }
 0x165   :  { %v1138_v48 = vadd.f32 %v1129_v6, %v949_v53 }
 0x16b   :  { %v1278_v12 = vpop.f32.mrf.mxu2 }
 0x16c   :  { %v1238_v9 = vpop.f32.mrf.mxu0  ;;  %v1325_v59 = vadd.f32 %v1278_v12, %v1136_v46 }
 0x16d   :  { %v1258_v10 = vpop.f32.mrf.mxu1  ;;  %v1323_v37 = vadd.f32 %v1238_v9, %v1134_v32 }
 0x16e   :  { %v1324_v50 = vadd.f32 %v1258_v10, %v1135_v3 }
 0x173   :  { %v1298_v15 = vpop.f32.mrf.mxu3 }
 0x174   :  { %v1318_v13 = vpop.f32.mrf.mxu0  ;;  %v1326_v63 = vadd.f32 %v1298_v15, %v1137_v54 }
 0x175   :  { %v1327_v11 = vadd.f32 %v1318_v13, %v1138_v48 }
 0x17b   :  { %v1407_v16 = vpop.f32.mrf.mxu2  ;;  %v1427_v26 = vpop.f32.mrf.mxu3 }
 0x17c   :  { %v1387_v14 = vpop.f32.mrf.mxu1  ;;  %v1511_v38 = vadd.f32 %v1407_v16, %v1322_v34  ;;  %v1512_v42 = vadd.f32 %v1427_v26, %v1323_v37 }
 0x17d   :  { %v1510_v39 = vadd.f32 %v1387_v14, %v1321_v33 }
 0x183   :  { %v1487_v27 = vpop.f32.mrf.mxu2 }
 0x184   :  { %v1447_v17 = vpop.f32.mrf.mxu0  ;;  %v1515_v4 = vadd.f32 %v1487_v27, %v1326_v63 }
 0x185   :  { %v1467_v18 = vpop.f32.mrf.mxu1  ;;  %v1513_v14 = vadd.f32 %v1447_v17, %v1324_v50  ;;  %v1717_v17 = vperm.slane %v3126_v31, 6 }
 0x186   :  { %v1514_v5 = vadd.f32 %v1467_v18, %v1325_v59 }
 0x18b   :  { %v1507_v55 = vpop.f32.mrf.mxu3 }
 0x18c   :  { %v1516_v6 = vadd.f32 %v1507_v55, %v1327_v11 }
 0x18d   :  { %v1576_v35 = vpop.f32.mrf.mxu0  ;;  %v1596_v36 = vpop.f32.mrf.mxu1 }
 0x18e   :  { %v1699_v43 = vadd.f32 %v1576_v35, %v1510_v39  ;;  %v1700_v45 = vadd.f32 %v1596_v36, %v1511_v38 }
 0x190   :  { %v1725_v8 = vmul.f32 %v1711_v41, %v1699_v43  ;;  %v1726_v9 = vmul.f32 %v1712_v47, %v1700_v45 }
 0x192   :  { %v1616_v57 = vpop.f32.mrf.mxu2  ;;  %v1732_v61 = vsel %vm64_vm1, %v1725_v8, 0.0  ;;  %v1733_v62 = vsel %vm64_vm1, %v1726_v9, 0.0 }
 0x193   :  { %v1701_v60 = vadd.f32 %v1616_v57, %v1512_v42  ;;  %v1734_v13 = vadd.f32 %v1733_v62, %v1732_v61 }
 0x195   :  { %v1727_v56 = vmul.f32 %v1713_v1, %v1701_v60 }
 0x197   :  { %v1735_v10 = vsel %vm64_vm1, %v1727_v56, 0.0 }
 0x198   :  { %v1736_v26 = vadd.f32 %v1735_v10, %v1734_v13 }
 0x19a   :  { %v1636_v16 = vpop.f32.mrf.mxu3 }
 0x19b   :  { %v1702_v12 = vadd.f32 %v1636_v16, %v1513_v14  ;;  %v1696_v15 = vpop.f32.mrf.mxu2 }
 0x19c   :  { %v1656_v20 = vpop.f32.mrf.mxu0  ;;  %v1676_v21 = vpop.f32.mrf.mxu1  ;;  %v1705_v23 = vadd.f32 %v1696_v15, %v1516_v6 }
 0x19d   :  { %v1728_v22 = vmul.f32 %v1714_v0, %v1702_v12  ;;  %v1703_v24 = vadd.f32 %v1656_v20, %v1514_v5  ;;  %v1704_v25 = vadd.f32 %v1676_v21, %v1515_v4 }
 0x19e   :  { %v1731_v30 = vmul.f32 %v1717_v17, %v1705_v23 }
 0x19f   :  { %v1737_v27 = vsel %vm64_vm1, %v1728_v22, 0.0  ;;  %v1729_v28 = vmul.f32 %v1715_v19, %v1703_v24  ;;  %v1730_v29 = vmul.f32 %v1716_v7, %v1704_v25 }
 0x1a0   :  { %v1738_v18 = vadd.f32 %v1737_v27, %v1736_v26  ;;  %v1743_v36 = vsel %vm64_vm1, %v1731_v30, 0.0 }
 0x1a1   :  { %v1739_v32 = vsel %vm64_vm1, %v1729_v28, 0.0  ;;  %v1741_v34 = vsel %vm64_vm1, %v1730_v29, 0.0 }
 0x1a2   :  { %v1740_v33 = vadd.f32 %v1739_v32, %v1738_v18 }
 0x1a4   :  { %v1742_v35 = vadd.f32 %v1741_v34, %v1740_v33 }
 0x1a6   :  { %v1744_v37 = vadd.f32 %v1743_v36, %v1742_v35 }
 0x1a8   :  { %1745 = vadd.xlane.f32.xlu1 %v1744_v37 }
 0x21b   :  { %v1746_v38 = vpop.xlane.xlu1 %1745 }
 0x21c   :  { %v1747_v39 = vmul.f32 0.0017301039, %v1746_v38 }
 0x21e   :  { %v1748_v40 = vsub.f32 %v1699_v43, %v1747_v39  ;;  %v1749_v42 = vsub.f32 %v1700_v45, %v1747_v39  ;;  %v1750_v49 = vsub.f32 %v1701_v60, %v1747_v39  ;;  %v1751_v51 = vsub.f32 %v1702_v12, %v1747_v39 }
 0x21f   :  { %v1752_v52 = vsub.f32 %v1703_v24, %v1747_v39  ;;  %v1753_v55 = vsub.f32 %v1704_v25, %v1747_v39  ;;  %v1754_v53 = vsub.f32 %v1705_v23, %v1747_v39 }
 0x220   :  { %v1755_v57 = vmul.f32 %v1748_v40, %v1711_v41  ;;  %v1756_v58 = vmul.f32 %v1749_v42, %v1712_v47  ;;  %v1757_v2 = vmul.f32 %v1750_v49, %v1713_v1  ;;  %v1758_v44 = vmul.f32 %v1751_v51, %v1714_v0 }
 0x221   :  { %v1759_v3 = vmul.f32 %v1752_v52, %v1715_v19  ;;  %v1760_v54 = vmul.f32 %v1753_v55, %v1716_v7  ;;  %v1761_v50 = vmul.f32 %v1754_v53, %v1717_v17 }
 0x222   :  { %v1762_v8 = vmul.f32 %v1755_v57, %v1755_v57  ;;  %v1763_v9 = vmul.f32 %v1756_v58, %v1756_v58  ;;  %v1764_v46 = vmul.f32 %v1757_v2, %v1757_v2  ;;  %v1765_v43 = vmul.f32 %v1758_v44, %v1758_v44  ;;  %v1900_v44 = vld [vmem:[%s3342_s1 + $0x18] sm:$0xff] }
 0x223   :  { %v1766_v56 = vmul.f32 %v1759_v3, %v1759_v3  ;;  %v1767_v47 = vmul.f32 %v1760_v54, %v1760_v54  ;;  %v1768_v63 = vmul.f32 %v1761_v50, %v1761_v50 }
 0x224   :  { %v1769_v45 = vsel %vm64_vm1, %v1762_v8, 0.0  ;;  %v1770_v60 = vsel %vm64_vm1, %v1763_v9, 0.0  ;;  %v1772_v41 = vsel %vm64_vm1, %v1764_v46, 0.0  ;;  %v1774_v1 = vsel %vm64_vm1, %v1765_v43, 0.0 }
 0x225   :  { %v1771_v48 = vadd.f32 %v1770_v60, %v1769_v45  ;;  %v1776_v11 = vsel %vm64_vm1, %v1766_v56, 0.0  ;;  %v1778_v61 = vsel %vm64_vm1, %v1767_v47, 0.0  ;;  %v1780_v0 = vsel %vm64_vm1, %v1768_v63, 0.0  ;;  %v1898_v56 = vld [vmem:[%s3342_s1 + $0x8] sm:$0xff] }
 0x227   :  { %v1773_v31 = vadd.f32 %v1772_v41, %v1771_v48  ;;  %v1899_v41 = vld [vmem:[%s3342_s1 + $0x10] sm:$0xff] }
 0x229   :  { %v1775_v59 = vadd.f32 %v1774_v1, %v1773_v31 }
 0x22b   :  { %v1777_v14 = vadd.f32 %v1776_v11, %v1775_v59  ;;  %v2714_v11 = vmov 8  }
 0x22c   :  { %2692 = vset.pattern.permute.xlu1 %v2714_v11  ;;  %2691 = vset.pattern.permute.xlu2 %v2714_v11 }
 0x22d   :  { %v1779_v62 = vadd.f32 %v1778_v61, %v1777_v14  ;;  %2690 = vset.pattern.permute.xlu0 %v2714_v11 }
 0x22f   :  { %v1781_v4 = vadd.f32 %v1780_v0, %v1779_v62 }
 0x231   :  { %1782 = vadd.xlane.f32.xlu2 %v1781_v4 }
 0x2a4   :  { %v1783_v16 = vpop.xlane.xlu2 %1782 }
 0x2a5   :  { %v1784_v19 = vmul.f32 0.0017301039, %v1783_v16 }
 0x2a7   :  { %v1785_v7 = vadd.f32 1e-05, %v1784_v19 }
 0x2a9   :  { %2695 = vrsqrt.f32 %v1785_v7  ;;  %vm1792_vm11 = vweird.f32 %v1785_v7 }
 0x2af   :  { %v2696_v5 = vpop.eup %2695 }
 0x2b0   :  { %v1787_v6 = vmul.f32 %v2696_v5, %v1785_v7  ;;  %vm1793_vm10 = vweird.f32 %v2696_v5 }
 0x2b1   :  { %vm1794_vm12 = vmor %vm1792_vm11, %vm1793_vm10 }
 0x2b2   :  { %v1788_v10 = vmul.f32 %v2696_v5, %v1787_v6 }
 0x2b4   :  { %v1789_v12 = vmul.f32 0.5, %v1788_v10 }
 0x2b6   :  { %v1790_v15 = vsub.f32 1.5, %v1789_v12 }
 0x2b8   :  { %v1791_v13 = vmul.f32 %v2696_v5, %v1790_v15 }
 0x2ba   :  { %v1795_v17 = vsel %vm1794_vm12, %v2696_v5, %v1791_v13 }
 0x2bb   :  { %v1796_v20 = vmul.f32 %v1795_v17, %v1748_v40  ;;  %v1797_v21 = vmul.f32 %v1795_v17, %v1749_v42  ;;  %v1798_v22 = vmul.f32 %v1795_v17, %v1750_v49  ;;  %v1799_v23 = vmul.f32 %v1795_v17, %v1751_v51  ;;  %v1897_v42 = vld [vmem:[%s3342_s1] sm:$0xff] }
 0x2bc   :  { %v1800_v24 = vmul.f32 %v1795_v17, %v1752_v52  ;;  %v1801_v25 = vmul.f32 %v1795_v17, %v1753_v55  ;;  %v1802_v26 = vmul.f32 %v1795_v17, %v1754_v53  ;;  %1921 = vrot.lane.b32.xlu1 %v1897_v42, %s2713_s18 }
 0x2bd   :  { %v1804_v27 = vmax.f32 %v1797_v21, 0.0  ;;  %v1806_v28 = vmax.f32 %v1799_v23, 0.0  ;;  %v1803_v30 = vmax.f32 %v1796_v20, 0.0  ;;  %v1805_v32 = vmax.f32 %v1798_v22, 0.0 }
 0x2be   :  { %v1808_v29 = vmax.f32 %v1801_v25, 0.0  ;;  %v1809_v18 = vmax.f32 %v1802_v26, 0.0  ;;  %v1807_v35 = vmax.f32 %v1800_v24, 0.0 }
 0x2bf   :  { %v1816_v33 = vrot.slane %v1804_v27, 4  ;;  %v1817_v34 = vrot.slane %v1806_v28, 4 }
 0x2c0   :  { %v1818_v36 = vrot.slane %v1808_v29, 4  ;;  %1828 = vst [vmem:[#allocation2 + $0x18] sm:$0xf] %v1809_v18 }
 0x2c1   :  { %v1819_v37 = vsel %vm64_vm1, %v1803_v30, %v1816_v33  ;;  %v1820_v38 = vsel %vm64_vm1, %v1805_v32, %v1817_v34 }
 0x2c2   :  { %v1821_v39 = vsel %vm64_vm1, %v1807_v35, %v1818_v36  ;;  %1840 = vrot.lane.b32.xlu0 %v1819_v37, %s2705_s13 }
 0x2c4   :  { %1927 = vrot.lane.b32.xlu1 %v1900_v44, %s2713_s18 }
 0x2c7   :  { %v1835_v40 = vld [vmem:[#allocation2 + $0x18] sm:$0xf] }
 0x2ca   :  { %1842 = vrot.lane.b32.xlu0 %v1820_v38, %s2705_s13 }
 0x2cc   :  { %1908 = vperm.xlu1 %2692, %v1898_v56  }
 0x2d2   :  { %1844 = vrot.lane.b32.xlu0 %v1821_v39, %s2705_s13 }
 0x2da   :  { %1846 = vrot.lane.b32.xlu0 %v1835_v40, %s2705_s13 }
 0x32e   :  { %v1922_v62 = vpop.permute.xlu1 %1921 }
 0x334   :  { %v1841_v49 = vpop.permute.xlu0 %1840 }
 0x335   :  { %v1848_v52 = vrot.slane %v1841_v49, 4 }
 0x336   :  { %v1928_v26 = vpop.permute.xlu1 %1927 }
 0x33c   :  { %v1843_v51 = vpop.permute.xlu0 %1842 }
 0x33d   :  { %v1849_v55 = vrot.slane %v1843_v51, 4 }
 0x33e   :  { %v3226_v34 = vpop.permute.xlu1 %1908 }
 0x33f   :  { %v1852_v57 = vsel %vm64_vm1, %v1848_v52, %v1849_v55 }
 0x340   :  { %v1853_v58 = vsel %vm52_vm0, %v1841_v49, %v1852_v57 }
 0x341   :  { %v1865_v2 = vmax.f32 %v1819_v37, %v1853_v58 }
 0x343   :  { %1873 = vrot.lane.b32.xlu0 %v1865_v2, %s2707_s27 }
 0x344   :  { %v1845_v53 = vpop.permute.xlu0 %1844 }
 0x345   :  { %v1850_v3 = vrot.slane %v1845_v53, 4 }
 0x347   :  { %v1854_v8 = vsel %vm64_vm1, %v1849_v55, %v1850_v3 }
 0x348   :  { %v1855_v9 = vsel %vm52_vm0, %v1843_v51, %v1854_v8 }
 0x349   :  { %v1866_v46 = vmax.f32 %v1820_v38, %v1855_v9 }
 0x34b   :  { %1875 = vrot.lane.b32.xlu2 %v1866_v46, %s2707_s27 }
 0x34c   :  { %v1847_v54 = vpop.permute.xlu0 %1846 }
 0x34d   :  { %v1851_v43 = vrot.slane %v1847_v54, 4  ;;  %v1868_v48 = vmax.f32 %v1835_v40, %v1847_v54 }
 0x34f   :  { %v1856_v45 = vsel %vm64_vm1, %v1850_v3, %v1851_v43 }
 0x350   :  { %v1857_v60 = vsel %vm52_vm0, %v1845_v53, %v1856_v45  ;;  %vm2332_vm0 = vcmask 1041408  }
 0x351   :  { %v1867_v50 = vmax.f32 %v1821_v39, %v1857_v60 }
 0x353   :  { %1879 = vrot.lane.b32.xlu2 %v1868_v48, %s2707_s27  ;;  %1877 = vrot.lane.b32.xlu0 %v1867_v50, %s2707_s27 }
 0x35b   :  { %1923 = vrot.lane.b32.xlu0 %v1898_v56, %s2713_s18  ;;  %1913 = vperm.xlu2 %2691, %v1899_v41  }
 0x363   :  { %1925 = vrot.lane.b32.xlu0 %v1899_v41, %s2713_s18  ;;  %1903 = vperm.xlu2 %2691, %v1897_v42  }
 0x36b   :  { %1918 = vperm.xlu0 %2690, %v1900_v44  }
 0x3a5   :  { %v1876_v31 = vpop.permute.xlu2 %1875 }
 0x3a6   :  { %v1882_v1 = vrot.slane %v1876_v31, 4 }
 0x3ad   :  { %v1880_v0 = vpop.permute.xlu2 %1879 }
 0x3ae   :  { %v1884_v7 = vrot.slane %v1880_v0, 4 }
 0x3b5   :  { %v1874_v47 = vpop.permute.xlu0 %1873  ;;  %v3224_v30 = vpop.permute.xlu2 %1913 }
 0x3b6   :  { %v1881_v59 = vrot.slane %v1874_v47, 4 }
 0x3b8   :  { %v1885_v63 = vsel %vm64_vm1, %v1881_v59, %v1882_v1 }
 0x3b9   :  { %v1886_v14 = vsel %vm589_vm4, %v1874_v47, %v1885_v63 }
 0x3ba   :  { %v1894_v61 = vmax.f32 %v1865_v2, %v1886_v14 }
 0x3bc   :  { %1932 = vst [vmem:[#allocation1] ss:$2 sm:$0xff] %v1894_v61 }
 0x3bd   :  { %v3233_v40 = vpop.permute.xlu2 %1903 }
 0x3c3   :  { %v1937_v4 = vld.sshfl [vmem:[#allocation1] sm:$0xff pattern:$0x75316420]  ;;  %v1938_v16 = vld.sshfl [vmem:[#allocation1 + $0x8] sm:$0xff pattern:$0x75316420] }
 0x3c4   :  { %2639 = vmatpush.msk.msrb.mxu3 %vm64_vm1, %v1937_v4  ;;  %2644 = vmatpush.msk.msra.mxu0 %vm64_vm1, %v1938_v16 }
 0x3c5   :  { %v1878_v19 = vpop.permute.xlu0 %1877  ;;  %2640 = vmatmul.msk.f32.vlgmr.msrb.gmra.mxu3 %vm60_vm2, %v1922_v62  ;;  %2645 = vmatmul.msk.f32.vlgmr.msra.gmra.mxu0 %vm60_vm2, %v1922_v62 }
 0x3c6   :  { %v1883_v5 = vrot.slane %v1878_v19, 4 }
 0x3c8   :  { %v1887_v6 = vsel %vm64_vm1, %v1882_v1, %v1883_v5  ;;  %v1889_v10 = vsel %vm64_vm1, %v1883_v5, %v1884_v7  ;;  %v3247_v1 = vld [vmem:[%s3342_s1 + $0x28] sm:$0x1] }
 0x3c9   :  { %v1888_v12 = vsel %vm589_vm4, %v1876_v31, %v1887_v6  ;;  %v1890_v15 = vsel %vm589_vm4, %v1878_v19, %v1889_v10 }
 0x3ca   :  { %v1895_v13 = vmax.f32 %v1866_v46, %v1888_v12  ;;  %v1896_v17 = vmax.f32 %v1867_v50, %v1890_v15 }
 0x3cc   :  { %1934 = vst [vmem:[#allocation1 + $0x10] ss:$2 sm:$0xff] %v1895_v13 }
 0x3cd   :  { %1936 = vst [vmem:[#allocation1 + $0x20] ss:$2 sm:$0xff] %v1896_v17  ;;  %v1924_v20 = vpop.permute.xlu0 %1923 }
 0x3ce   :  { %2641 = vmatmul.msk.f32.gmra.mxu3 %vm60_vm2, %v1924_v20  ;;  %2646 = vmatmul.msk.f32.gmra.mxu0 %vm60_vm2, %v1924_v20 }
 0x3d3   :  { %v1939_v21 = vld.sshfl [vmem:[#allocation1 + $0x10] sm:$0xff pattern:$0x75316420]  ;;  %v1940_v22 = vld.sshfl [vmem:[#allocation1 + $0x18] sm:$0xff pattern:$0x75316420] }
 0x3d4   :  { %2649 = vmatpush.msk.msra.mxu1 %vm64_vm1, %v1939_v21  ;;  %2654 = vmatpush.msk.msra.mxu2 %vm64_vm1, %v1940_v22  ;;  %v1941_v23 = vld.sshfl [vmem:[#allocation1 + $0x20] sm:$0xff pattern:$0x75316420]  ;;  %v1942_v24 = vld.sshfl [vmem:[#allocation1 + $0x28] sm:$0xff pattern:$0x75316420] }
 0x3d5   :  { %2659 = vmatpush.msk.msra.mxu3 %vm64_vm1, %v1941_v23  ;;  %2664 = vmatpush.msk.msrb.mxu0 %vm64_vm1, %v1942_v24  ;;  %v1926_v25 = vpop.permute.xlu0 %1925  ;;  %vm2336_vm1 = vcmask 1044483  }
 0x3d6   :  { %2650 = vmatmul.msk.f32.vlgmr.msra.gmra.mxu1 %vm60_vm2, %v1922_v62  ;;  %2655 = vmatmul.msk.f32.vlgmr.msra.gmra.mxu2 %vm60_vm2, %v1922_v62 }
 0x3d7   :  { %2642 = vmatmul.msk.f32.gmra.mxu3 %vm60_vm2, %v1926_v25  ;;  %2647 = vmatmul.msk.f32.gmra.mxu0 %vm60_vm2, %v1926_v25 }
 0x3dd   :  { %v3230_v37 = vpop.permute.xlu0 %1918 }
 0x3de   :  { %2651 = vmatmul.msk.f32.gmra.mxu1 %vm60_vm2, %v1924_v20  ;;  %2656 = vmatmul.msk.f32.gmra.mxu2 %vm60_vm2, %v1924_v20 }
 0x3df   :  { %2643 = vmatmul.msk.f32.gmra.mxu3 %vm60_vm2, %v1928_v26  ;;  %2648 = vmatmul.msk.f32.gmra.mxu0 %vm60_vm2, %v1928_v26 }
 0x3e6   :  { %2652 = vmatmul.msk.f32.gmra.mxu1 %vm60_vm2, %v1926_v25  ;;  %2657 = vmatmul.msk.f32.gmra.mxu2 %vm60_vm2, %v1926_v25 }
 0x3e7   :  { %2660 = vmatmul.msk.f32.vlgmr.msra.gmra.mxu3 %vm60_vm2, %v1922_v62  ;;  %2665 = vmatmul.msk.f32.vlgmr.msrb.gmra.mxu0 %vm60_vm2, %v1922_v62  ;;  %v2715_v62 = vmov 32  }
 0x3e8   :  { %2693 = vset.pattern.permute.xlu1 %v2715_v62  ;;  %2694 = vset.pattern.permute.xlu0 %v2715_v62 }
 0x3e9   :  { %2188 = vperm.xlu1 %2693, %v3247_v1  }
 0x3ee   :  { %2653 = vmatmul.msk.f32.gmra.mxu1 %vm60_vm2, %v1928_v26  ;;  %2658 = vmatmul.msk.f32.gmra.mxu2 %vm60_vm2, %v1928_v26 }
 0x3ef   :  { %2661 = vmatmul.msk.f32.gmra.mxu3 %vm60_vm2, %v1924_v20  ;;  %2666 = vmatmul.msk.f32.gmra.mxu0 %vm60_vm2, %v1924_v20 }
 0x3f7   :  { %2662 = vmatmul.msk.f32.gmra.mxu3 %vm60_vm2, %v1926_v25  ;;  %2667 = vmatmul.msk.f32.gmra.mxu0 %vm60_vm2, %v1926_v25 }
 0x3ff   :  { %2663 = vmatmul.msk.f32.gmra.mxu3 %vm60_vm2, %v1928_v26  ;;  %2668 = vmatmul.msk.f32.gmra.mxu0 %vm60_vm2, %v1928_v26  ;;  %vm2338_vm2 = vcmask 1042432  }
 0x442   :  { %v2009_v27 = vpop.f32.mrf.mxu0 }
 0x443   :  { %v2010_v57 = vadd.f32 %v2009_v27, %v3233_v40 }
 0x445   :  { %v2138_v43 = vmul.f32 0.01, %v2010_v57 }
 0x447   :  { %v2162_v47 = vmax.f32 %v2010_v57, %v2138_v43 }
 0x448   :  { %v1980_v28 = vpop.f32.mrf.mxu3 }
 0x449   :  { %v1981_v60 = vadd.f32 %v1980_v28, %v3233_v40 }
 0x44b   :  { %v2012_v29 = vpop.f32.mrf.mxu0  ;;  %v2137_v59 = vmul.f32 0.01, %v1981_v60 }
 0x44c   :  { %v2013_v51 = vadd.f32 %v2012_v29, %v3226_v34 }
 0x44d   :  { %v2161_v5 = vmax.f32 %v1981_v60, %v2137_v59 }
 0x44e   :  { %v2144_v53 = vmul.f32 0.01, %v2013_v51 }
 0x450   :  { %v2168_v56 = vmax.f32 %v2013_v51, %v2144_v53 }
 0x451   :  { %v1983_v18 = vpop.f32.mrf.mxu3 }
 0x452   :  { %v1984_v8 = vadd.f32 %v1983_v18, %v3226_v34 }
 0x453   :  { %v2038_v32 = vpop.f32.mrf.mxu1 }
 0x454   :  { %v2015_v33 = vpop.f32.mrf.mxu0  ;;  %v2143_v41 = vmul.f32 0.01, %v1984_v8  ;;  %v2039_v6 = vadd.f32 %v2038_v32, %v3233_v40 }
 0x455   :  { %v2016_v38 = vadd.f32 %v2015_v33, %v3224_v30 }
 0x456   :  { %v2167_v0 = vmax.f32 %v1984_v8, %v2143_v41  ;;  %v2139_v21 = vmul.f32 0.01, %v2039_v6 }
 0x457   :  { %v2150_v52 = vmul.f32 0.01, %v2016_v38 }
 0x458   :  { %v2163_v32 = vmax.f32 %v2039_v6, %v2139_v21 }
 0x459   :  { %v3228_v35 = vpop.f32.mrf.mxu2  ;;  %v2174_v9 = vmax.f32 %v2016_v38, %v2150_v52 }
 0x45a   :  { %v1986_v36 = vpop.f32.mrf.mxu3  ;;  %v2068_v26 = vadd.f32 %v3228_v35, %v3233_v40 }
 0x45b   :  { %v2041_v39 = vpop.f32.mrf.mxu1  ;;  %v1987_v58 = vadd.f32 %v1986_v36, %v3224_v30 }
 0x45c   :  { %v2018_v42 = vpop.f32.mrf.mxu0  ;;  %v2042_v16 = vadd.f32 %v2041_v39, %v3226_v34  ;;  %v2140_v38 = vmul.f32 0.01, %v2068_v26 }
 0x45d   :  { %v2019_v49 = vadd.f32 %v2018_v42, %v3230_v37  ;;  %v2149_v48 = vmul.f32 0.01, %v1987_v58 }
 0x45e   :  { %v2145_v15 = vmul.f32 0.01, %v2042_v16  ;;  %v2164_v51 = vmax.f32 %v2068_v26, %v2140_v38 }
 0x45f   :  { %v2156_v55 = vmul.f32 0.01, %v2019_v49  ;;  %v2173_v63 = vmax.f32 %v1987_v58, %v2149_v48 }
 0x460   :  { %v2169_v27 = vmax.f32 %v2042_v16, %v2145_v15  ;;  %v2676_v16 = vld [vmem:[%s3341_s0 + $0x5] ss:$8 sm:$0x30] }
 0x461   :  { %v2180_v2 = vmax.f32 %v2019_v49, %v2156_v55  ;;  %v2070_v44 = vpop.f32.mrf.mxu2 }
 0x462   :  { %v1989_v3 = vpop.f32.mrf.mxu3  ;;  %v2071_v22 = vadd.f32 %v2070_v44, %v3226_v34 }
 0x463   :  { %v1990_v46 = vadd.f32 %v1989_v3, %v3230_v37  ;;  %v2044_v54 = vpop.f32.mrf.mxu1  ;;  %2226 = vmatpush.msrb.mxu2 %v2180_v2 }
 0x464   :  { %v3241_v45 = vpop.f32.mrf.mxu0  ;;  %v2045_v14 = vadd.f32 %v2044_v54, %v3224_v30  ;;  %v2146_v33 = vmul.f32 0.01, %v2071_v22 }
 0x465   :  { %v2155_v50 = vmul.f32 0.01, %v1990_v46  ;;  %2227 = vmatpush.msrb.mxu2 %v2174_v9  ;;  %v2126_v58 = vadd.f32 %v3241_v45, %v3233_v40 }
 0x466   :  { %v2151_v10 = vmul.f32 0.01, %v2045_v14  ;;  %v2170_v42 = vmax.f32 %v2071_v22, %v2146_v33 }
 0x467   :  { %v2179_v31 = vmax.f32 %v1990_v46, %v2155_v50  ;;  %2228 = vmatpush.msrb.mxu2 %v2168_v56  ;;  %v2142_v46 = vmul.f32 0.01, %v2126_v58 }
 0x468   :  { %v2175_v23 = vmax.f32 %v2045_v14, %v2151_v10 }
 0x469   :  { %v2073_v11 = vpop.f32.mrf.mxu2  ;;  %2206 = vmatpush.msrb.mxu1 %v2179_v31  ;;  %2229 = vmatpush.msrb.mxu2 %v2162_v47  ;;  %v2166_v41 = vmax.f32 %v2126_v58, %v2142_v46 }
 0x46a   :  { %v3250_v61 = vpop.f32.mrf.mxu3  ;;  %2670 = vmatmul.msk.f32.vlgmr.msrb.gmra.mxu2 %vm2191_vm13, %v3247_v1  ;;  %v2074_v13 = vadd.f32 %v2073_v11, %v3224_v30  ;;  %v2189_v11 = vpop.permute.xlu1 %2188 }
 0x46b   :  { %v2047_v4 = vpop.f32.mrf.mxu1  ;;  %2207 = vmatpush.msrb.mxu1 %v2173_v63  ;;  %v2097_v45 = vadd.f32 %v3250_v61, %v3233_v40 }
 0x46c   :  { %v2048_v19 = vadd.f32 %v2047_v4, %v3230_v37  ;;  %v2128_v7 = vpop.f32.mrf.mxu0  ;;  %v2152_v28 = vmul.f32 0.01, %v2074_v13  ;;  %v2675_v4 = vld [vmem:[%s3341_s0 + $0x5] ss:$8 sm:$0xf] }
 0x46d   :  { %2208 = vmatpush.msrb.mxu1 %v2167_v0  ;;  %v2129_v55 = vadd.f32 %v2128_v7, %v3226_v34 }
 0x46e   :  { %v2157_v12 = vmul.f32 0.01, %v2048_v19  ;;  %v2176_v39 = vmax.f32 %v2074_v13, %v2152_v28 }
 0x46f   :  { %2209 = vmatpush.msrb.mxu1 %v2161_v5  ;;  %v2148_v53 = vmul.f32 0.01, %v2129_v55  ;;  %v2678_v5 = vld [vmem:[%s3341_s0 + $0x6] ss:$8 sm:$0x30] }
 0x470   :  { %v2181_v17 = vmax.f32 %v2048_v19, %v2157_v12  ;;  %2669 = vmatmul.msk.f32.vlgmr.msrb.gmra.mxu1 %vm2191_vm13, %v3247_v1 }
 0x471   :  { %v2076_v20 = vpop.f32.mrf.mxu2  ;;  %v2172_v48 = vmax.f32 %v2129_v55, %v2148_v53 }
 0x472   :  { %v2077_v24 = vadd.f32 %v2076_v20, %v3230_v37  ;;  %v2099_v25 = vpop.f32.mrf.mxu3  ;;  %2246 = vmatpush.msra.mxu1 %v2181_v17  ;;  %v2317_v17 = vor.u32 %v2676_v16, %v2675_v4 }
 0x473   :  { %v2100_v54 = vadd.f32 %v2099_v25, %v3226_v34 }
 0x474   :  { %v2158_v29 = vmul.f32 0.01, %v2077_v24  ;;  %v2131_v18 = vpop.f32.mrf.mxu0  ;;  %2247 = vmatpush.msra.mxu1 %v2175_v23  ;;  %vm2318_vm3 = vcmp.gt.f32.partialorder %v2317_v17, 0.0 }
 0x475   :  { %v2132_v35 = vadd.f32 %v2131_v18, %v3224_v30  ;;  %v2147_v31 = vmul.f32 0.01, %v2100_v54 }
 0x476   :  { %v2182_v36 = vmax.f32 %v2077_v24, %v2158_v29  ;;  %2248 = vmatpush.msra.mxu1 %v2169_v27 }
 0x477   :  { %v2154_v2 = vmul.f32 0.01, %v2132_v35  ;;  %v2171_v34 = vmax.f32 %v2100_v54, %v2147_v31 }
 0x478   :  { %2249 = vmatpush.msra.mxu1 %v2163_v32  ;;  %2266 = vmatpush.msra.mxu2 %v2182_v36 }
 0x479   :  { %2671 = vmatmul.msk.f32.vlgmr.msra.gmra.mxu1 %vm2191_vm13, %v3247_v1  ;;  %v2178_v43 = vmax.f32 %v2132_v35, %v2154_v2 }
 0x47a   :  { %v2102_v49 = vpop.f32.mrf.mxu3  ;;  %2267 = vmatpush.msra.mxu2 %v2176_v39 }
 0x47b   :  { %v2103_v3 = vadd.f32 %v2102_v49, %v3224_v30  ;;  %v2141_v30 = vmul.f32 0.01, %v2097_v45 }
 0x47c   :  { %v2134_v52 = vpop.f32.mrf.mxu0  ;;  %2268 = vmatpush.msra.mxu2 %v2170_v42 }
 0x47d   :  { %v2135_v57 = vadd.f32 %v2134_v52, %v3230_v37  ;;  %v2153_v50 = vmul.f32 0.01, %v2103_v3 }
 0x47e   :  { %2269 = vmatpush.msra.mxu2 %v2164_v51 }
 0x47f   :  { %v2160_v44 = vmul.f32 0.01, %v2135_v57  ;;  %2672 = vmatmul.msk.f32.vlgmr.msra.gmra.mxu2 %vm2191_vm13, %v3247_v1  ;;  %v2177_v59 = vmax.f32 %v2103_v3, %v2153_v50 }
 0x481   :  { %v2184_v8 = vmax.f32 %v2135_v57, %v2160_v44 }
 0x482   :  { %v2105_v9 = vpop.f32.mrf.mxu3 }
 0x483   :  { %v2106_v60 = vadd.f32 %v2105_v9, %v3230_v37  ;;  %2306 = vmatpush.msrb.mxu2 %v2184_v8  ;;  %v2165_v37 = vmax.f32 %v2097_v45, %v2141_v30 }
 0x485   :  { %v2159_v56 = vmul.f32 0.01, %v2106_v60  ;;  %2307 = vmatpush.msrb.mxu2 %v2178_v43 }
 0x487   :  { %v2183_v47 = vmax.f32 %v2106_v60, %v2159_v56  ;;  %2308 = vmatpush.msrb.mxu2 %v2172_v48 }
 0x489   :  { %2286 = vmatpush.msrb.mxu1 %v2183_v47  ;;  %2309 = vmatpush.msrb.mxu2 %v2166_v41 }
 0x48a   :  { %2674 = vmatmul.msk.f32.vlgmr.msrb.gmra.mxu2 %vm2191_vm13, %v3247_v1 }
 0x48b   :  { %2287 = vmatpush.msrb.mxu1 %v2177_v59 }
 0x48d   :  { %2288 = vmatpush.msrb.mxu1 %v2171_v34 }
 0x48f   :  { %2289 = vmatpush.msrb.mxu1 %v2165_v37 }
 0x490   :  { %2673 = vmatmul.msk.f32.vlgmr.msrb.gmra.mxu1 %vm2191_vm13, %v3247_v1  ;;  %v2677_v1 = vld [vmem:[%s3341_s0 + $0x6] ss:$8 sm:$0xf] }
 0x491   :  { %v2422_v20 = vor.u32 %v2678_v5, %v2677_v1 }
 0x493   :  { %vm2423_vm4 = vcmp.gt.f32.partialorder %v2422_v20, 0.0 }
 0x4ed   :  { %v2211_v40 = vpop.f32.mrf.mxu1  ;;  %v2231_v63 = vpop.f32.mrf.mxu2 }
 0x4ee   :  { %v2232_v62 = vadd.f32 %v2231_v63, %v2189_v11  ;;  %v2212_v19 = vadd.f32 %v2211_v40, %v2189_v11 }
 0x4f0   :  { %v2325_v0 = vrot.slane %v2232_v62, 7 }
 0x4f2   :  { %v2331_v22 = vsel %vm2330_vm14, %v2212_v19, %v2325_v0 }
 0x4f6   :  { %v2251_v61 = vpop.f32.mrf.mxu1 }
 0x4f7   :  { %v2252_v7 = vadd.f32 %v2251_v61, %v2189_v11 }
 0x4f9   :  { %v2326_v21 = vrot.slane %v2252_v7, 6 }
 0x4fb   :  { %v2333_v27 = vsel %vm2332_vm0, %v2331_v22, %v2326_v21 }
 0x502   :  { %v2271_v14 = vpop.f32.mrf.mxu2 }
 0x503   :  { %v2272_v6 = vadd.f32 %v2271_v14, %v2189_v11 }
 0x505   :  { %v2327_v23 = vrot.slane %v2272_v6, 5 }
 0x50d   :  { %v2291_v10 = vpop.f32.mrf.mxu1  ;;  %v2311_v12 = vpop.f32.mrf.mxu2 }
 0x50e   :  { %v2292_v15 = vadd.f32 %v2291_v10, %v2189_v11  ;;  %v2312_v13 = vadd.f32 %v2311_v12, %v2189_v11 }
 0x510   :  { %v2328_v24 = vrot.slane %v2292_v15, 4  ;;  %v2329_v25 = vrot.slane %v2312_v13, 3 }
 0x512   :  { %v2335_v26 = vsel %vm2334_vm15, %v2327_v23, %v2328_v24 }
 0x513   :  { %v2337_v28 = vsel %vm2336_vm1, %v2335_v26, %v2329_v25 }
 0x514   :  { %v2339_v29 = vsel %vm2338_vm2, %v2333_v27, %v2337_v28 }
 0x515   :  { %v2341_v18 = vsel %vm2318_vm3, %v2339_v29, -inf  ;;  %v2424_v32 = vsel %vm2423_vm4, %v2339_v29, -inf }
 0x516   :  { %v2426_v33 = vperm.slane %v2424_v32, 0  ;;  %v2427_v36 = vperm.slane %v2424_v32, 1  ;;  %v2428_v38 = vperm.slane %v2424_v32, 2  ;;  %v2429_v39 = vperm.slane %v2424_v32, 3 }
 0x517   :  { %v2430_v42 = vperm.slane %v2424_v32, 4  ;;  %v2431_v49 = vperm.slane %v2424_v32, 5  ;;  %v2343_v35 = vperm.slane %v2341_v18, 0  ;;  %v2344_v51 = vperm.slane %v2341_v18, 1 }
 0x518   :  { %v2438_v52 = vsel %vm2330_vm14, %v2426_v33, -inf  ;;  %v2439_v55 = vsel %vm2330_vm14, %v2427_v36, -inf  ;;  %v2440_v57 = vsel %vm2330_vm14, %v2428_v38, -inf  ;;  %v2441_v58 = vsel %vm2330_vm14, %v2429_v39, -inf }
 0x519   :  { %v2442_v2 = vsel %vm2330_vm14, %v2430_v42, -inf  ;;  %v2444_v44 = vsel %vm2330_vm14, %v2431_v49, -inf  ;;  %v2345_v53 = vperm.slane %v2341_v18, 2  ;;  %v2346_v9 = vperm.slane %v2341_v18, 3 }
 0x51a   :  { %v2443_v3 = vmax.f32 %v2438_v52, %v2442_v2  ;;  %v2445_v8 = vmax.f32 %v2439_v55, %v2444_v44  ;;  %v2347_v46 = vperm.slane %v2341_v18, 4  ;;  %v2348_v54 = vperm.slane %v2341_v18, 5 }
 0x51b   :  { %v2355_v43 = vsel %vm2330_vm14, %v2343_v35, -inf  ;;  %v2356_v60 = vsel %vm2330_vm14, %v2344_v51, -inf  ;;  %v2447_v48 = vmax.f32 %v2440_v57, %v2441_v58  ;;  %v2357_v56 = vsel %vm2330_vm14, %v2345_v53, -inf }
 0x51c   :  { %v2446_v45 = vmax.f32 %v2443_v3, %v2445_v8  ;;  %v2359_v50 = vsel %vm2330_vm14, %v2347_v46, -inf  ;;  %v2358_v41 = vsel %vm2330_vm14, %v2346_v9, -inf  ;;  %v2361_v47 = vsel %vm2330_vm14, %v2348_v54, -inf }
 0x51d   :  { %v2360_v31 = vmax.f32 %v2355_v43, %v2359_v50  ;;  %v2362_v59 = vmax.f32 %v2356_v60, %v2361_v47  ;;  %v2364_v37 = vmax.f32 %v2357_v56, %v2358_v41 }
 0x51e   :  { %v2448_v30 = vmax.f32 %v2446_v45, %v2447_v48 }
 0x51f   :  { %v2363_v34 = vmax.f32 %v2360_v31, %v2362_v59 }
 0x520   :  { %2449 = vmax.xlane.f32.xlu2 %v2448_v30 }
 0x521   :  { %v2365_v40 = vmax.f32 %v2363_v34, %v2364_v37 }
 0x523   :  { %2366 = vmax.xlane.f32.xlu0 %v2365_v40 }
 0x593   :  { %v2450_v63 = vpop.xlane.xlu2 %2449 }
 0x594   :  { %v2452_v11 = vperm.slane %v2450_v63, 0 }
 0x596   :  { %v2454_v14 = vsub.f32 %v2424_v32, %v2452_v11  ;;  %v2367_v61 = vpop.xlane.xlu0 %2366 }
 0x597   :  { %v2369_v0 = vperm.slane %v2367_v61, 0 }
 0x598   :  { %v2455_v62 = vmul.f32 1.442695, %v2454_v14  ;;  %v2502_v14 = vlaneseq }
 0x599   :  { %v2371_v4 = vsub.f32 %v2341_v18, %v2369_v0 }
 0x59a   :  { %2697 = vpow2.f32 %v2455_v62  ;;  %vm2504_vm13 = vcmp.lt.s32.totalorder %v2502_v14, 768 }
 0x59b   :  { %v2372_v16 = vmul.f32 1.442695, %v2371_v4 }
 0x59d   :  { %2699 = vpow2.f32 %v2372_v16 }
 0x5a0   :  { %v3308_v19 = vpop.eup %2697 }
 0x5a1   :  { %v2458_v7 = vperm.slane %v3308_v19, 0  ;;  %v2459_v1 = vperm.slane %v3308_v19, 1  ;;  %v2460_v5 = vperm.slane %v3308_v19, 2  ;;  %v2461_v6 = vperm.slane %v3308_v19, 3 }
 0x5a2   :  { %v2462_v13 = vperm.slane %v3308_v19, 4  ;;  %v2463_v24 = vperm.slane %v3308_v19, 5 }
 0x5a3   :  { %v2470_v10 = vsel %vm2330_vm14, %v2458_v7, 0.0  ;;  %v2471_v12 = vsel %vm2330_vm14, %v2459_v1, 0.0  ;;  %v3316_v15 = vpop.eup %2699  ;;  %v2473_v20 = vsel %vm2330_vm14, %v2460_v5, 0.0  ;;  %v2475_v26 = vsel %vm2330_vm14, %v2461_v6, 0.0 }
 0x5a4   :  { %v2472_v17 = vadd.f32 %v2471_v12, %v2470_v10  ;;  %v2375_v21 = vperm.slane %v3316_v15, 0  ;;  %v2376_v22 = vperm.slane %v3316_v15, 1  ;;  %v2377_v23 = vperm.slane %v3316_v15, 2 }
 0x5a5   :  { %v2378_v27 = vperm.slane %v3316_v15, 3  ;;  %v2477_v33 = vsel %vm2330_vm14, %v2462_v13, 0.0  ;;  %v2379_v36 = vperm.slane %v3316_v15, 4  ;;  %v2479_v49 = vsel %vm2330_vm14, %v2463_v24, 0.0 }
 0x5a6   :  { %v2474_v25 = vadd.f32 %v2473_v20, %v2472_v17  ;;  %v2387_v28 = vsel %vm2330_vm14, %v2375_v21, 0.0  ;;  %v2388_v29 = vsel %vm2330_vm14, %v2376_v22, 0.0  ;;  %v2390_v38 = vsel %vm2330_vm14, %v2377_v23, 0.0 }
 0x5a7   :  { %v2389_v32 = vadd.f32 %v2388_v29, %v2387_v28  ;;  %v2380_v35 = vperm.slane %v3316_v15, 5  ;;  %v2392_v51 = vsel %vm2330_vm14, %v2378_v27, 0.0  ;;  %v2394_v57 = vsel %vm2330_vm14, %v2379_v36, 0.0 }
 0x5a8   :  { %v2476_v18 = vadd.f32 %v2475_v26, %v2474_v25 }
 0x5a9   :  { %v2391_v42 = vadd.f32 %v2390_v38, %v2389_v32  ;;  %v2396_v2 = vsel %vm2330_vm14, %v2380_v35, 0.0 }
 0x5aa   :  { %v2478_v39 = vadd.f32 %v2477_v33, %v2476_v18 }
 0x5ab   :  { %v2393_v55 = vadd.f32 %v2392_v51, %v2391_v42 }
 0x5ac   :  { %v2480_v52 = vadd.f32 %v2479_v49, %v2478_v39 }
 0x5ad   :  { %v2395_v58 = vadd.f32 %v2394_v57, %v2393_v55 }
 0x5ae   :  { %2481 = vadd.xlane.f32.xlu0 %v2480_v52 }
 0x5af   :  { %v2397_v44 = vadd.f32 %v2396_v2, %v2395_v58 }
 0x5b1   :  { %2398 = vadd.xlane.f32.xlu1 %v2397_v44 }
 0x621   :  { %v2482_v53 = vpop.xlane.xlu0 %2481 }
 0x622   :  { %v2484_v3 = vperm.slane %v2482_v53, 0 }
 0x624   :  { %2701 = vrcp.f32 %v2484_v3  ;;  %v2399_v8 = vpop.xlane.xlu1 %2398  ;;  %v2495_v45 = vand.u32 2147483647, %v2484_v3  ;;  %v2497_v48 = vand.u32 2147483648, %v2484_v3  ;;  %vm2491_vm6 = vweird.f32 %v2484_v3 }
 0x625   :  { %v2401_v9 = vperm.slane %v2399_v8, 0 }
 0x626   :  { %vm2496_vm8 = vcmp.eq.f32.partialorder %v2495_v45, 8.507059e+37  ;;  %v2498_v30 = vor.u32 1.1754944e-38, %v2497_v48 }
 0x627   :  { %2703 = vrcp.f32 %v2401_v9  ;;  %v2414_v47 = vand.u32 2147483648, %v2401_v9  ;;  %v2412_v34 = vand.u32 2147483647, %v2401_v9  ;;  %vm2408_vm10 = vweird.f32 %v2401_v9 }
 0x629   :  { %v2415_v11 = vor.u32 1.1754944e-38, %v2414_v47  ;;  %vm2413_vm12 = vcmp.eq.f32.partialorder %v2412_v34, 8.507059e+37 }
 0x62a   :  { %v2702_v46 = vpop.eup %2701 }
 0x62b   :  { %v2487_v54 = vmul.f32 %v2702_v46, %v2484_v3  ;;  %vm2492_vm5 = vweird.f32 %v2702_v46 }
 0x62c   :  { %vm2493_vm7 = vmor %vm2491_vm6, %vm2492_vm5 }
 0x62d   :  { %v2488_v43 = vsub.f32 1.0, %v2487_v54  ;;  %v2704_v60 = vpop.eup %2703 }
 0x62e   :  { %v2404_v50 = vmul.f32 %v2704_v60, %v2401_v9  ;;  %vm2409_vm9 = vweird.f32 %v2704_v60 }
 0x62f   :  { %v2489_v56 = vmul.f32 %v2702_v46, %v2488_v43  ;;  %vm2410_vm11 = vmor %vm2408_vm10, %vm2409_vm9 }
 0x630   :  { %v2405_v41 = vsub.f32 1.0, %v2404_v50 }
 0x631   :  { %v2490_v31 = vadd.f32 %v2702_v46, %v2489_v56 }
 0x632   :  { %v2406_v59 = vmul.f32 %v2704_v60, %v2405_v41 }
 0x633   :  { %v2494_v37 = vsel %vm2493_vm7, %v2702_v46, %v2490_v31 }
 0x634   :  { %v2499_v40 = vsel %vm2496_vm8, %v2498_v30, %v2494_v37  ;;  %v2407_v63 = vadd.f32 %v2704_v60, %v2406_v59 }
 0x635   :  { %v2500_v62 = vmul.f32 %v3308_v19, %v2499_v40 }
 0x636   :  { %v2411_v61 = vsel %vm2410_vm11, %v2704_v60, %v2407_v63 }
 0x637   :  { %v2416_v0 = vsel %vm2413_vm12, %v2415_v11, %v2411_v61 }
 0x638   :  { %v2417_v4 = vmul.f32 %v3316_v15, %v2416_v0 }
 0x63a   :  { %v2501_v16 = vadd.f32 %v2500_v62, %v2417_v4 }
 0x63c   :  { %2506 = vst.msk [vmem:[%s3343_s2] sm:$0x3f] %vm2504_vm13, %v2501_v16 }

</bundles_post_ra>
